<compile_context>
chip_gen: v7x
topology: tpu7x:2x2x1
jax: 0.10.0
libtpu: 0.0.40
codegen_flags: <defaults>
</compile_context>

<pallas_src>
import functools

import jax
import jax.numpy as jnp
from jax.experimental import pallas as pl
from jax.experimental.pallas import tpu as pltpu  # noqa: F401  (TPU backend)


# ----------------------------------------------------------------------------
# Model constants (synthetic small sizes; real ResNet-50 would be F_OUT=2048)
# ----------------------------------------------------------------------------
PATCH = 4          # patch-conv stride / kernel of the embedder stand-in
F_OUT = 8          # feature_embedder_out
HIDDEN = 32        # hidden_size


# ----------------------------------------------------------------------------
# Pallas kernels (single-block; every operand is VMEM-resident)
# ----------------------------------------------------------------------------
def _embed_kernel(xpT_ref, wT_ref, b_ref, o_ref):
    """Patch embedder, transposed for lane density:
       yT = relu(w_patchT (F,K) @ xpT (K,M) + b (F,1)) -> (F, M) = (8, 128)."""
    y = jnp.dot(wT_ref[...], xpT_ref[...], preferred_element_type=jnp.float32)
    o_ref[...] = jnp.maximum(y + b_ref[...], 0.0).astype(o_ref.dtype)


def _encdec_kernel(x_ref, w_ef_ref, b_ef_ref, w_eo_ref, b_eo_ref,
                   w_kvq_ref, b_kvq_ref, w_do_ref, b_do_ref,
                   w_out_ref, b_out_ref, o_ref, *, B, S, N, Hd):
    """Fused encoder + decoder + final projection + frame-0 residual.

    x_ref: (B*S, F) token features (raw torch-.view ordering).
    w_ef : (F, 4H)  = [w_in | w_in @ w_qkv]   (attention scale folded into Q)
    w_kvq: (H, 3H)  = [w_k  | w_v | w_q]      (attention scale folded into Q)
    out  : (B*N, F) decoder tokens + frame-0 tokens."""
    x = x_ref[...]                                              # (B*S, F)
    Fo = x_ref.shape[1]

    # ---------------- encoder: fused in-proj + QKV (one 128-wide matmul) ----
    hqkv = (jnp.dot(x, w_ef_ref[...], preferred_element_type=jnp.float32)
            + b_ef_ref[...])                                    # (B*S, 4H)
    h = hqkv[:, 0 * Hd:1 * Hd]                                  # (B*S, H)
    q = hqkv[:, 1 * Hd:2 * Hd].reshape(B, S, Hd)                # already scaled
    k = hqkv[:, 2 * Hd:3 * Hd].reshape(B, S, Hd)
    v = hqkv[:, 3 * Hd:4 * Hd].reshape(B, S, Hd)

    s = jnp.einsum("bqd,bkd->bqk", q, k, preferred_element_type=jnp.float32)
    s = s - jnp.max(s, axis=-1, keepdims=True)
    p = jnp.exp(s)
    p = p * pl.reciprocal(jnp.sum(p, axis=-1, keepdims=True), approx=True)
    a = jnp.einsum("bqk,bkd->bqd", p, v,
                   preferred_element_type=jnp.float32).reshape(B * S, Hd)

    enc = h + (jnp.dot(a, w_eo_ref[...], preferred_element_type=jnp.float32)
               + b_eo_ref[...])                                 # (B*S, H) residual

    # ---------------- decoder: fused K|V|Q projection (one 96-wide matmul) --
    kvq = (jnp.dot(enc, w_kvq_ref[...], preferred_element_type=jnp.float32)
           + b_kvq_ref[...])                                    # (B*S, 3H)
    kd = kvq[:, 0 * Hd:1 * Hd].reshape(B, S, Hd)
    vd = kvq[:, 1 * Hd:2 * Hd].reshape(B, S, Hd)
    qd = kvq.reshape(B, S, 3 * Hd)[:, :N, 2 * Hd:3 * Hd]        # query = first N tokens

    s2 = jnp.einsum("bqd,bkd->bqk", qd, kd, preferred_element_type=jnp.float32)
    s2 = s2 - jnp.max(s2, axis=-1, keepdims=True)
    p2 = jnp.exp(s2)
    p2 = p2 * pl.reciprocal(jnp.sum(p2, axis=-1, keepdims=True), approx=True)
    a2 = jnp.einsum("bqk,bkd->bqd", p2, vd,
                    preferred_element_type=jnp.float32).reshape(B * N, Hd)

    query = enc.reshape(B, S, Hd)[:, :N, :].reshape(B * N, Hd)
    d = query + (jnp.dot(a2, w_do_ref[...], preferred_element_type=jnp.float32)
                 + b_do_ref[...])                               # (B*N, H) residual

    # final feature projection + fused frame-0 residual (same raw token layout)
    y = (jnp.dot(d, w_out_ref[...], preferred_element_type=jnp.float32)
         + b_out_ref[...])                                      # (B*N, Fo)
    frame0 = x.reshape(B, S, Fo)[:, :N, :].reshape(B * N, Fo)   # frame-0 tokens
    o_ref[...] = (y + frame0).astype(o_ref.dtype)


# ----------------------------------------------------------------------------
# Forward pass (layout plumbing in plain JAX, all compute in Pallas)
# ----------------------------------------------------------------------------
def base_backbone_forward(x, params):
    """x: (B, T, C, H, W) -> (B, F_OUT, H//P, W//P)."""
    B, T, C, H, W = x.shape
    P = PATCH
    hP, wP = H // P, W // P
    SP = hP * wP                 # spatial positions per frame
    N = SP                       # tokens per frame implied by torch .view
    S = T * N
    BT = B * T
    M = BT * SP                  # total spatial positions (= 128 at test size)
    K = C * P * P

    # --- im2col, transposed (K, M): columns are (bt, hi, wi) spatial tokens ---
    xp6 = x.reshape(BT, C, hP, P, wP, P)
    xpT = jnp.transpose(xp6, (1, 3, 5, 0, 2, 4)).reshape(K, M)

    emb = params["embedder"]
    featT = pl.pallas_call(
        _embed_kernel,
        out_shape=jax.ShapeDtypeStruct((F_OUT, M), jnp.float32),
    )(xpT, emb["w_patch_t"], emb["b_patch"])
    # featT[f, bt*SP + sp] == feats_nchw[bt, f, sp]

    # torch:  feats.view(B, T, -1, F)  -- raw reinterpretation of NCHW storage.
    # Done in the wrapper (free XLA layout op); it is the only minor-dim
    # changing relayout in the whole forward.
    feats_nchw = jnp.transpose(featT.reshape(F_OUT, BT, SP), (1, 0, 2))  # (BT,F,SP)
    x2d = feats_nchw.reshape(B * S, F_OUT)                               # token rows

    ed = params["encdec"]
    kernel = functools.partial(_encdec_kernel, B=B, S=S, N=N, Hd=HIDDEN)
    out2d = pl.pallas_call(
        kernel,
        out_shape=jax.ShapeDtypeStruct((B * N, F_OUT), jnp.float32),
    )(x2d, ed["w_ef"], ed["b_ef"], ed["w_eo"], ed["b_eo"],
      ed["w_kvq"], ed["b_kvq"], ed["w_do"], ed["b_do"],
      ed["w_out"], ed["b_out"])

    # torch: feats.view(B, T, F, w, h)[:, 0] + decoder_embeddings  -> (B,F,w,h)
    # (inverse raw view; pure reshape, free)
    return out2d.reshape(B, F_OUT, hP, wP)


# Pure-JAX reference (same fused params) for a lowering-correctness check.
def _reference_forward(x, params):
    B, T, C, H, W = x.shape
    P = PATCH
    hP, wP = H // P, W // P
    SP = hP * wP
    N, S, BT, Hd = SP, T * SP, B * T, HIDDEN
    emb, ed = params["embedder"], params["encdec"]

    xp = jnp.transpose(x.reshape(BT, C, hP, P, wP, P),
                       (0, 2, 4, 1, 3, 5)).reshape(BT * SP, C * P * P)
    y = jnp.maximum(xp @ emb["w_patch_t"].T + emb["b_patch"].reshape(1, -1), 0.0)
    feats = jnp.transpose(y.reshape(BT, SP, F_OUT), (0, 2, 1))        # (BT,F,SP)
    x2d = feats.reshape(B * S, F_OUT)

    hqkv = x2d @ ed["w_ef"] + ed["b_ef"]
    h = hqkv[:, :Hd]
    q = hqkv[:, Hd:2 * Hd].reshape(B, S, Hd)
    k = hqkv[:, 2 * Hd:3 * Hd].reshape(B, S, Hd)
    v = hqkv[:, 3 * Hd:].reshape(B, S, Hd)
    p = jax.nn.softmax(jnp.einsum("bqd,bkd->bqk", q, k), axis=-1)
    a = jnp.einsum("bqk,bkd->bqd", p, v).reshape(B * S, Hd)
    enc = h + a @ ed["w_eo"] + ed["b_eo"]

    kvq = enc @ ed["w_kvq"] + ed["b_kvq"]
    kd = kvq[:, :Hd].reshape(B, S, Hd)
    vd = kvq[:, Hd:2 * Hd].reshape(B, S, Hd)
    qd = kvq.reshape(B, S, 3 * Hd)[:, :N, 2 * Hd:]
    p2 = jax.nn.softmax(jnp.einsum("bqd,bkd->bqk", qd, kd), axis=-1)
    a2 = jnp.einsum("bqk,bkd->bqd", p2, vd).reshape(B * N, Hd)
    query = enc.reshape(B, S, Hd)[:, :N, :].reshape(B * N, Hd)
    d = query + a2 @ ed["w_do"] + ed["b_do"]
    out2d = (d @ ed["w_out"] + ed["b_out"]
             + x2d.reshape(B, S, F_OUT)[:, :N, :].reshape(B * N, F_OUT))
    return out2d.reshape(B, F_OUT, hP, wP)


# ----------------------------------------------------------------------------
# Deterministic parameter init with inference-time weight fusion
# ----------------------------------------------------------------------------
def init_params(key):
    def dense(k, fan_in, fan_out):
        kw, kb = jax.random.split(k)
        w = jax.random.normal(kw, (fan_in, fan_out), jnp.float32) / jnp.sqrt(float(fan_in))
        b = 0.01 * jax.random.normal(kb, (fan_out,), jnp.float32)
        return w, b

    keys = jax.random.split(key, 12)
    K_patch = 3 * PATCH * PATCH
    w_patch, b_patch = dense(keys[0], K_patch, F_OUT)
    w_in, b_in = dense(keys[1], F_OUT, HIDDEN)
    ewq, ebq = dense(keys[2], HIDDEN, HIDDEN)
    ewk, ebk = dense(keys[3], HIDDEN, HIDDEN)
    ewv, ebv = dense(keys[4], HIDDEN, HIDDEN)
    ewo, ebo = dense(keys[5], HIDDEN, HIDDEN)
    dwq, dbq = dense(keys[6], HIDDEN, HIDDEN)
    dwk, dbk = dense(keys[7], HIDDEN, HIDDEN)
    dwv, dbv = dense(keys[8], HIDDEN, HIDDEN)
    dwo, dbo = dense(keys[9], HIDDEN, HIDDEN)
    w_out, b_out = dense(keys[10], HIDDEN, F_OUT)

    scale = 1.0 / (float(HIDDEN) ** 0.5)
    # fold 1/sqrt(H) into the Q weights (encoder & decoder)
    w_qkv = jnp.concatenate([ewq * scale, ewk, ewv], axis=1)        # (H, 3H)
    b_qkv = jnp.concatenate([ebq * scale, ebk, ebv], axis=0)
    # fold w_in into the QKV projection -> one (F, 4H) = (8, 128) matmul
    w_ef = jnp.concatenate([w_in, w_in @ w_qkv], axis=1)            # (8, 128)
    b_ef = jnp.concatenate([b_in, b_in @ w_qkv + b_qkv], axis=0)    # (128,)
    # decoder fused K | V | Q (scale folded into Q)
    w_kvq = jnp.concatenate([dwk, dwv, dwq * scale], axis=1)        # (32, 96)
    b_kvq = jnp.concatenate([dbk, dbv, dbq * scale], axis=0)

    def row(b):
        return b.reshape(1, -1)

    return {
        "embedder": {"w_patch_t": w_patch.T,                        # (8, 48)
                     "b_patch": b_patch.reshape(F_OUT, 1)},         # (8, 1)
        "encdec": {
            "w_ef": w_ef, "b_ef": row(b_ef),
            "w_eo": ewo, "b_eo": row(ebo),
            "w_kvq": w_kvq, "b_kvq": row(b_kvq),
            "w_do": dwo, "b_do": row(dbo),
            "w_out": w_out, "b_out": row(b_out),
        },
    }


# ----------------------------------------------------------------------------
if __name__ == "__main__":
    key = jax.random.PRNGKey(0)
    kx, kp = jax.random.split(key)
    B, T, C, H, W = 2, 4, 3, 16, 16
    x = jax.random.normal(kx, (B, T, C, H, W), jnp.float32)
    params = init_params(kp)

    fwd = jax.jit(base_backbone_forward)
    out = jax.block_until_ready(fwd(x, params))

    assert out.shape == (B, F_OUT, H // PATCH, W // PATCH), out.shape
    assert out.dtype == jnp.float32
    assert bool(jnp.all(jnp.isfinite(out)))

    # Numerical check vs. pure-JAX reference (loose tol: approx reciprocal in
    # the kernel softmax introduces ~1e-3 relative error by design).
    ref = jax.block_until_ready(jax.jit(_reference_forward)(x, params))
    assert bool(jnp.allclose(out, ref, rtol=3e-2, atol=3e-2))

    print("KERNEL_OK")
</pallas_src>

<mosaic_0001>
module attributes {stable_mosaic.version = 11 : i64} {
  func.func @_embed_kernel(%arg0: memref<48x128xf32, #tpu.memory_space<vmem>>, %arg1: memref<8x48xf32, #tpu.memory_space<vmem>>, %arg2: memref<8x1xf32, #tpu.memory_space<vmem>>, %arg3: memref<8x128xf32, #tpu.memory_space<vmem>>) attributes {dimension_semantics = [], scalar_prefetch = 0 : i64, scratch_operands = 0 : i64, tpu.core_type = #tpu.core_type<tc>} {
    %c0 = arith.constant 0 : index
    %c0_0 = arith.constant 0 : index
    %0 = vector.load %arg1[%c0, %c0_0] : memref<8x48xf32, #tpu.memory_space<vmem>>, vector<8x48xf32>
    %c0_1 = arith.constant 0 : index
    %c0_2 = arith.constant 0 : index
    %1 = vector.load %arg0[%c0_1, %c0_2] : memref<48x128xf32, #tpu.memory_space<vmem>>, vector<48x128xf32>
    %cst = arith.constant dense<0.000000e+00> : vector<8x128xf32>
    %2 = tpu.matmul %0, %1, %cst {dimension_numbers = #tpu.dot_dimension_numbers<[1], [0], [0], [1], [0, 0, 1, 1], [], []>} : vector<8x48xf32>, vector<48x128xf32>, vector<8x128xf32> -> vector<8x128xf32>
    %c0_3 = arith.constant 0 : index
    %c0_4 = arith.constant 0 : index
    %3 = vector.load %arg2[%c0_3, %c0_4] : memref<8x1xf32, #tpu.memory_space<vmem>>, vector<8x1xf32>
    %4 = vector.broadcast %3 : vector<8x1xf32> to vector<8x128xf32>
    %5 = arith.addf %2, %4 : vector<8x128xf32>
    %cst_5 = arith.constant 0.000000e+00 : f32
    %6 = vector.broadcast %cst_5 : f32 to vector<8x128xf32>
    %7 = arith.maximumf %5, %6 : vector<8x128xf32>
    %c0_6 = arith.constant 0 : index
    %c0_7 = arith.constant 0 : index
    %8 = vector.load %arg3[%c0_6, %c0_7] : memref<8x128xf32, #tpu.memory_space<vmem>>, vector<8x128xf32>
    tpu.vector_store %arg3[%c0_6, %c0_7], %7 {strides = array<i32>} : memref<8x128xf32, #tpu.memory_space<vmem>>, vector<8x128xf32>,
    return
  }
}

module attributes {stable_mosaic.version = 11 : i64} {
  func.func @_encdec_kernel(%arg0: memref<128x8xf32, #tpu.memory_space<vmem>>, %arg1: memref<8x128xf32, #tpu.memory_space<vmem>>, %arg2: memref<1x128xf32, #tpu.memory_space<vmem>>, %arg3: memref<32x32xf32, #tpu.memory_space<vmem>>, %arg4: memref<1x32xf32, #tpu.memory_space<vmem>>, %arg5: memref<32x96xf32, #tpu.memory_space<vmem>>, %arg6: memref<1x96xf32, #tpu.memory_space<vmem>>, %arg7: memref<32x32xf32, #tpu.memory_space<vmem>>, %arg8: memref<1x32xf32, #tpu.memory_space<vmem>>, %arg9: memref<32x8xf32, #tpu.memory_space<vmem>>, %arg10: memref<1x8xf32, #tpu.memory_space<vmem>>, %arg11: memref<32x8xf32, #tpu.memory_space<vmem>>) attributes {dimension_semantics = [], scalar_prefetch = 0 : i64, scratch_operands = 0 : i64, tpu.core_type = #tpu.core_type<tc>} {
    %c0 = arith.constant 0 : index
    %c0_0 = arith.constant 0 : index
    %0 = vector.load %arg0[%c0, %c0_0] : memref<128x8xf32, #tpu.memory_space<vmem>>, vector<128x8xf32>
    %c0_1 = arith.constant 0 : index
    %c0_2 = arith.constant 0 : index
    %1 = vector.load %arg1[%c0_1, %c0_2] : memref<8x128xf32, #tpu.memory_space<vmem>>, vector<8x128xf32>
    %cst = arith.constant dense<0.000000e+00> : vector<128x128xf32>
    %2 = tpu.matmul %0, %1, %cst {dimension_numbers = #tpu.dot_dimension_numbers<[1], [0], [0], [1], [0, 0, 1, 1], [], []>} : vector<128x8xf32>, vector<8x128xf32>, vector<128x128xf32> -> vector<128x128xf32>
    %c0_3 = arith.constant 0 : index
    %c0_4 = arith.constant 0 : index
    %3 = vector.load %arg2[%c0_3, %c0_4] : memref<1x128xf32, #tpu.memory_space<vmem>>, vector<1x128xf32>
    %4 = vector.broadcast %3 : vector<1x128xf32> to vector<128x128xf32>
    %5 = arith.addf %2, %4 : vector<128x128xf32>
    %6 = vector.extract_strided_slice %5 {offsets = [0, 0], sizes = [128, 32], strides = [1, 1]} : vector<128x128xf32> to vector<128x32xf32>
    %7 = vector.extract_strided_slice %5 {offsets = [0, 32], sizes = [128, 32], strides = [1, 1]} : vector<128x128xf32> to vector<128x32xf32>
    %8 = vector.shape_cast %7 : vector<128x32xf32> to vector<2x64x32xf32>
    %9 = vector.extract_strided_slice %5 {offsets = [0, 64], sizes = [128, 32], strides = [1, 1]} : vector<128x128xf32> to vector<128x32xf32>
    %10 = vector.shape_cast %9 : vector<128x32xf32> to vector<2x64x32xf32>
    %11 = vector.extract_strided_slice %5 {offsets = [0, 96], sizes = [128, 32], strides = [1, 1]} : vector<128x128xf32> to vector<128x32xf32>
    %12 = vector.shape_cast %11 : vector<128x32xf32> to vector<2x64x32xf32>
    "tpu.trace_start"() <{level = 10 : i32, message = "bqd,bkd->bqk"}> : () -> ()
    %cst_5 = arith.constant dense<0.000000e+00> : vector<2x64x64xf32>
    %13 = tpu.matmul %8, %10, %cst_5 {dimension_numbers = #tpu.dot_dimension_numbers<[2], [2], [1], [1], [0, 0, 0, 1, 1, 1], [0], [0]>} : vector<2x64x32xf32>, vector<2x64x32xf32>, vector<2x64x64xf32> -> vector<2x64x64xf32>
    "tpu.trace_stop"() : () -> ()
    %cst_6 = arith.constant dense<0xFF800000> : vector<2x64xf32>
    %14 = vector.multi_reduction <maximumf>, %13, %cst_6 [2] : vector<2x64x64xf32> to vector<2x64xf32>
    %15 = vector.shape_cast %14 : vector<2x64xf32> to vector<2x64x1xf32>
    %16 = vector.broadcast %15 : vector<2x64x1xf32> to vector<2x64x64xf32>
    %17 = arith.subf %13, %16 : vector<2x64x64xf32>
    %18 = math.exp %17 : vector<2x64x64xf32>
    %cst_7 = arith.constant dense<0.000000e+00> : vector<2x64xf32>
    %19 = vector.multi_reduction <add>, %18, %cst_7 [2] : vector<2x64x64xf32> to vector<2x64xf32>
    %20 = vector.shape_cast %19 : vector<2x64xf32> to vector<2x64x1xf32>
    %21 = tpu.reciprocal %20 {approx = true} : vector<2x64x1xf32> -> vector<2x64x1xf32>
    %22 = vector.broadcast %21 : vector<2x64x1xf32> to vector<2x64x64xf32>
    %23 = arith.mulf %18, %22 : vector<2x64x64xf32>
    "tpu.trace_start"() <{level = 10 : i32, message = "bqk,bkd->bqd"}> : () -> ()
    %cst_8 = arith.constant dense<0.000000e+00> : vector<2x64x32xf32>
    %24 = tpu.matmul %23, %12, %cst_8 {dimension_numbers = #tpu.dot_dimension_numbers<[2], [1], [1], [2], [0, 0, 0, 1, 1, 2], [0], [0]>} : vector<2x64x64xf32>, vector<2x64x32xf32>, vector<2x64x32xf32> -> vector<2x64x32xf32>
    "tpu.trace_stop"() : () -> ()
    %25 = vector.shape_cast %24 : vector<2x64x32xf32> to vector<128x32xf32>
    %c0_9 = arith.constant 0 : index
    %c0_10 = arith.constant 0 : index
    %26 = vector.load %arg3[%c0_9, %c0_10] : memref<32x32xf32, #tpu.memory_space<vmem>>, vector<32x32xf32>
    %cst_11 = arith.constant dense<0.000000e+00> : vector<128x32xf32>
    %27 = tpu.matmul %25, %26, %cst_11 {dimension_numbers = #tpu.dot_dimension_numbers<[1], [0], [0], [1], [0, 0, 1, 1], [], []>} : vector<128x32xf32>, vector<32x32xf32>, vector<128x32xf32> -> vector<128x32xf32>
    %c0_12 = arith.constant 0 : index
    %c0_13 = arith.constant 0 : index
    %28 = vector.load %arg4[%c0_12, %c0_13] : memref<1x32xf32, #tpu.memory_space<vmem>>, vector<1x32xf32>
    %29 = vector.broadcast %28 : vector<1x32xf32> to vector<128x32xf32>
    %30 = arith.addf %27, %29 : vector<128x32xf32>
    %31 = arith.addf %6, %30 : vector<128x32xf32>
    %c0_14 = arith.constant 0 : index
    %c0_15 = arith.constant 0 : index
    %32 = vector.load %arg5[%c0_14, %c0_15] : memref<32x96xf32, #tpu.memory_space<vmem>>, vector<32x96xf32>
    %cst_16 = arith.constant dense<0.000000e+00> : vector<128x96xf32>
    %33 = tpu.matmul %31, %32, %cst_16 {dimension_numbers = #tpu.dot_dimension_numbers<[1], [0], [0], [1], [0, 0, 1, 1], [], []>} : vector<128x32xf32>, vector<32x96xf32>, vector<128x96xf32> -> vector<128x96xf32>
    %c0_17 = arith.constant 0 : index
    %c0_18 = arith.constant 0 : index
    %34 = vector.load %arg6[%c0_17, %c0_18] : memref<1x96xf32, #tpu.memory_space<vmem>>, vector<1x96xf32>
    %35 = vector.broadcast %34 : vector<1x96xf32> to vector<128x96xf32>
    %36 = arith.addf %33, %35 : vector<128x96xf32>
    %37 = vector.extract_strided_slice %36 {offsets = [0, 0], sizes = [128, 32], strides = [1, 1]} : vector<128x96xf32> to vector<128x32xf32>
    %38 = vector.shape_cast %37 : vector<128x32xf32> to vector<2x64x32xf32>
    %39 = vector.extract_strided_slice %36 {offsets = [0, 32], sizes = [128, 32], strides = [1, 1]} : vector<128x96xf32> to vector<128x32xf32>
    %40 = vector.shape_cast %39 : vector<128x32xf32> to vector<2x64x32xf32>
    %41 = vector.shape_cast %36 : vector<128x96xf32> to vector<2x64x96xf32>
    %42 = vector.extract_strided_slice %41 {offsets = [0, 0, 64], sizes = [2, 16, 32], strides = [1, 1, 1]} : vector<2x64x96xf32> to vector<2x16x32xf32>
    "tpu.trace_start"() <{level = 10 : i32, message = "bqd,bkd->bqk"}> : () -> ()
    %cst_19 = arith.constant dense<0.000000e+00> : vector<2x16x64xf32>
    %43 = tpu.matmul %42, %38, %cst_19 {dimension_numbers = #tpu.dot_dimension_numbers<[2], [2], [1], [1], [0, 0, 0, 1, 1, 1], [0], [0]>} : vector<2x16x32xf32>, vector<2x64x32xf32>, vector<2x16x64xf32> -> vector<2x16x64xf32>
    "tpu.trace_stop"() : () -> ()
    %cst_20 = arith.constant dense<0xFF800000> : vector<2x16xf32>
    %44 = vector.multi_reduction <maximumf>, %43, %cst_20 [2] : vector<2x16x64xf32> to vector<2x16xf32>
    %45 = vector.shape_cast %44 : vector<2x16xf32> to vector<2x16x1xf32>
    %46 = vector.broadcast %45 : vector<2x16x1xf32> to vector<2x16x64xf32>
    %47 = arith.subf %43, %46 : vector<2x16x64xf32>
    %48 = math.exp %47 : vector<2x16x64xf32>
    %cst_21 = arith.constant dense<0.000000e+00> : vector<2x16xf32>
    %49 = vector.multi_reduction <add>, %48, %cst_21 [2] : vector<2x16x64xf32> to vector<2x16xf32>
    %50 = vector.shape_cast %49 : vector<2x16xf32> to vector<2x16x1xf32>
    %51 = tpu.reciprocal %50 {approx = true} : vector<2x16x1xf32> -> vector<2x16x1xf32>
    %52 = vector.broadcast %51 : vector<2x16x1xf32> to vector<2x16x64xf32>
    %53 = arith.mulf %48, %52 : vector<2x16x64xf32>
    "tpu.trace_start"() <{level = 10 : i32, message = "bqk,bkd->bqd"}> : () -> ()
    %cst_22 = arith.constant dense<0.000000e+00> : vector<2x16x32xf32>
    %54 = tpu.matmul %53, %40, %cst_22 {dimension_numbers = #tpu.dot_dimension_numbers<[2], [1], [1], [2], [0, 0, 0, 1, 1, 2], [0], [0]>} : vector<2x16x64xf32>, vector<2x64x32xf32>, vector<2x16x32xf32> -> vector<2x16x32xf32>
    "tpu.trace_stop"() : () -> ()
    %55 = vector.shape_cast %54 : vector<2x16x32xf32> to vector<32x32xf32>
    %56 = vector.shape_cast %31 : vector<128x32xf32> to vector<2x64x32xf32>
    %57 = vector.extract_strided_slice %56 {offsets = [0, 0, 0], sizes = [2, 16, 32], strides = [1, 1, 1]} : vector<2x64x32xf32> to vector<2x16x32xf32>
    %58 = vector.shape_cast %57 : vector<2x16x32xf32> to vector<32x32xf32>
    %c0_23 = arith.constant 0 : index
    %c0_24 = arith.constant 0 : index
    %59 = vector.load %arg7[%c0_23, %c0_24] : memref<32x32xf32, #tpu.memory_space<vmem>>, vector<32x32xf32>
    %cst_25 = arith.constant dense<0.000000e+00> : vector<32x32xf32>
    %60 = tpu.matmul %55, %59, %cst_25 {dimension_numbers = #tpu.dot_dimension_numbers<[1], [0], [0], [1], [0, 0, 1, 1], [], []>} : vector<32x32xf32>, vector<32x32xf32>, vector<32x32xf32> -> vector<32x32xf32>
    %c0_26 = arith.constant 0 : index
    %c0_27 = arith.constant 0 : index
    %61 = vector.load %arg8[%c0_26, %c0_27] : memref<1x32xf32, #tpu.memory_space<vmem>>, vector<1x32xf32>
    %62 = vector.broadcast %61 : vector<1x32xf32> to vector<32x32xf32>
    %63 = arith.addf %60, %62 : vector<32x32xf32>
    %64 = arith.addf %58, %63 : vector<32x32xf32>
    %c0_28 = arith.constant 0 : index
    %c0_29 = arith.constant 0 : index
    %65 = vector.load %arg9[%c0_28, %c0_29] : memref<32x8xf32, #tpu.memory_space<vmem>>, vector<32x8xf32>
    %cst_30 = arith.constant dense<0.000000e+00> : vector<32x8xf32>
    %66 = tpu.matmul %64, %65, %cst_30 {dimension_numbers = #tpu.dot_dimension_numbers<[1], [0], [0], [1], [0, 0, 1, 1], [], []>} : vector<32x32xf32>, vector<32x8xf32>, vector<32x8xf32> -> vector<32x8xf32>
    %c0_31 = arith.constant 0 : index
    %c0_32 = arith.constant 0 : index
    %67 = vector.load %arg10[%c0_31, %c0_32] : memref<1x8xf32, #tpu.memory_space<vmem>>, vector<1x8xf32>
    %68 = vector.broadcast %67 : vector<1x8xf32> to vector<32x8xf32>
    %69 = arith.addf %66, %68 : vector<32x8xf32>
    %70 = vector.shape_cast %0 : vector<128x8xf32> to vector<2x64x8xf32>
    %71 = vector.extract_strided_slice %70 {offsets = [0, 0, 0], sizes = [2, 16, 8], strides = [1, 1, 1]} : vector<2x64x8xf32> to vector<2x16x8xf32>
    %72 = vector.shape_cast %71 : vector<2x16x8xf32> to vector<32x8xf32>
    %73 = arith.addf %69, %72 : vector<32x8xf32>
    %c0_33 = arith.constant 0 : index
    %c0_34 = arith.constant 0 : index
    %74 = vector.load %arg11[%c0_33, %c0_34] : memref<32x8xf32, #tpu.memory_space<vmem>>, vector<32x8xf32>
    tpu.vector_store %arg11[%c0_33, %c0_34], %73 {strides = array<i32>} : memref<32x8xf32, #tpu.memory_space<vmem>>, vector<32x8xf32>,
    return
  }
}

</mosaic_0001>

<bundles_post_ra>
// kernel: base_backbone_forward.2
= control target key start
LH: loop header
LB: loop body
LE: loop exit
PB: predicated region body
PF: predicated region fallthrough
CT: control target
= control target key end

     0   :  { %v144_v0 = vmov 0.0|0.0   ;;  %vm145_vm0 = vmmov 0   ;;  %v146_v4 = vmov 0.0   ;;  %v147_v7 = vmov 0   ;;  %s195_s0 = inlined_call_operand.vmem [shape: f32[48,128], index: 0, kind: input, shape index: {}]   ;;  %s196_s2 = inlined_call_operand.vmem [shape: f32[8,1], index: 2, kind: input, shape index: {}]   ;;  %s197_s1 = inlined_call_operand.vmem [shape: f32[8,48], index: 1, kind: input, shape index: {}]   ;;  %s198_s3 = inlined_call_operand.vmem [shape: f32[8,128], index: 3, kind: output, shape index: {}]  }
   0x1   :  { %130 = vmatprep.subr.bf16.mxu0 %v144_v0  ;;  %v15_v1 = vld [vmem:[%s195_s0] sm:$0xff]  ;;  %v16_v2 = vld [vmem:[%s195_s0 + $0x8] sm:$0xff]  ;;  %v17_v3 = vld [vmem:[%s195_s0 + $0x10] sm:$0xff]  ;;  %127 = vmatprep.mubr.msk.f32.mxu0 %vm145_vm0, %v146_v4  ;;  %vm27_vm1 = vcmask 392192  }
   0x2   :  { %v131_v5 = vpack.c.bf16 %v16_v2, %v15_v1  ;;  %v18_v6 = vld [vmem:[%s195_s0 + $0x18] sm:$0xff]  ;;  %143 = vset.pattern.permute.xlu0 %v147_v7  ;;  %v21_v8 = vld [vmem:[%s196_s2] sm:$0xff]  ;;  %v20_v11 = vld [vmem:[%s195_s0 + $0x28] sm:$0xff] }
   0x3   :  { %v134_v9 = vpack.c.bf16 %v18_v6, %v17_v3  ;;  %24 = vperm.xlu0 %143, %v21_v8   ;;  %v19_v10 = vld [vmem:[%s195_s0 + $0x20] sm:$0xff] }
   0x4   :  { %132 = vmatpush3.bf16.msra.mxu0 %v131_v5  ;;  %v137_v12 = vpack.c.bf16 %v20_v11, %v19_v10  ;;  %v14_v13 = vld [vmem:[%s197_s1] sm:$0xff] }
   0x5   :  { %133 = vmatprep.subr.bf16.mxu0 %v144_v0 }
   0x8   :  { %135 = vmatpush3.bf16.msra.mxu0 %v134_v9 }
   0x9   :  { %136 = vmatprep.subr.bf16.mxu0 %v144_v0 }
   0xc   :  { %138 = vmatpush3.bf16.msra.mxu0 %v137_v12 }
   0xf   :  { %128 = vmatmul.mubr.msk.f32.vlgmr.msra.gmra.mrb[0].mxu0 %vm27_vm1, %v14_v13 }
  0x82   :  { %v25_v14 = vpop.permute.xlu0 %24 }
  0xe2   :  { %v97_v15 = vpop.f32.mrb[0].mxu0 }
  0xe3   :  { %v98_v16 = vadd.f32 %v97_v15, %v25_v14  ;;  %v129_v17 = vpop.f32.mrb[1].mxu0 }
  0xe5   :  { %v101_v18 = vmax.f32 %v98_v16, 0.0 }
  0xe7   :  { %102 = vst [vmem:[%s198_s3] sm:$0xff] %v101_v18 }

// kernel: base_backbone_forward.3
= control target key start
LH: loop header
LB: loop body
LE: loop exit
PB: predicated region body
PF: predicated region fallthrough
CT: control target
= control target key end

     0   :  { %vm62_vm0 = vcmask 64512   ;;  %s3233_s13 = smov 64   ;;  %s3235_s14 = smov 32   ;;  %vm296_vm1 = vcmask 261120   ;;  %vm611_vm3 = vcmask 523264   ;;  %s3974_s1 = inlined_call_operand.vmem [shape: f32[8,128], index: 1, kind: input, shape index: {}]   ;;  %s3975_s0 = inlined_call_operand.vmem [shape: f32[128,8], index: 0, kind: input, shape index: {}]   ;;  %s3976_s2 = inlined_call_operand.vmem [shape: f32[1,128], index: 2, kind: input, shape index: {}]   ;;  %s3977_s3 = inlined_call_operand.vmem [shape: f32[32,32], index: 3, kind: input, shape index: {}]   ;;  %s3978_s5 = inlined_call_operand.vmem [shape: f32[32,96], index: 5, kind: input, shape index: {}]   ;;  %s3979_s4 = inlined_call_operand.vmem [shape: f32[1,32], index: 4, kind: input, shape index: {}]   ;;  %s3980_s6 = inlined_call_operand.vmem [shape: f32[1,96], index: 6, kind: input, shape index: {}]   ;;  %s3981_s7 = inlined_call_operand.vmem [shape: f32[32,32], index: 7, kind: input, shape index: {}]   ;;  %s3982_s9 = inlined_call_operand.vmem [shape: f32[32,8], index: 9, kind: input, shape index: {}]   ;;  %s3983_s8 = inlined_call_operand.vmem [shape: f32[1,32], index: 8, kind: input, shape index: {}]   ;;  %s3984_s10 = inlined_call_operand.vmem [shape: f32[1,8], index: 10, kind: input, shape index: {}]   ;;  %s3985_s11 = inlined_call_operand.vmem [shape: f32[32,8], index: 11, kind: output, shape index: {}]  }
   0x1   :  { %v54_v0 = vld [vmem:[%s3974_s1] sm:$0xff]  ;;  %v39_v2 = vld [vmem:[%s3975_s0 + $0x8] sm:$0xff]  ;;  %v40_v3 = vld [vmem:[%s3975_s0 + $0x10] sm:$0xff] }
   0x2   :  { %v38_v1 = vld [vmem:[%s3975_s0] sm:$0xff]  ;;  %2528 = vmatprep.subr.mxu0 %v54_v0  ;;  %v41_v4 = vld [vmem:[%s3975_s0 + $0x18] sm:$0xff]  ;;  %v43_v6 = vld [vmem:[%s3975_s0 + $0x28] sm:$0xff] }
   0x3   :  { %2530 = vmatprep.mubr.msk.f32.mxu0 %vm62_vm0, %v38_v1  ;;  %2529 = vmatpush3.msra.mxu0 %v54_v0  ;;  %v42_v5 = vld [vmem:[%s3975_s0 + $0x20] sm:$0xff]  ;;  %v44_v7 = vld [vmem:[%s3975_s0 + $0x30] sm:$0xff]  ;;  %v45_v8 = vld [vmem:[%s3975_s0 + $0x38] sm:$0xff] }
   0x4   :  { %2531 = vmatmul.mubr.msk.f32.vlgmr.msra.gmra.mrb[0].mxu0 %vm62_vm0, %v39_v2  ;;  %v46_v9 = vld [vmem:[%s3975_s0 + $0x40] sm:$0xff]  ;;  %v47_v10 = vld [vmem:[%s3975_s0 + $0x48] sm:$0xff]  ;;  %v48_v11 = vld [vmem:[%s3975_s0 + $0x50] sm:$0xff] }
   0x5   :  { %2533 = vmatprep.mubr.msk.f32.mxu0 %vm62_vm0, %v40_v3  ;;  %v49_v12 = vld [vmem:[%s3975_s0 + $0x58] sm:$0xff]  ;;  %v50_v13 = vld [vmem:[%s3975_s0 + $0x60] sm:$0xff]  ;;  %v51_v14 = vld [vmem:[%s3975_s0 + $0x68] sm:$0xff] }
   0x6   :  { %v52_v15 = vld [vmem:[%s3975_s0 + $0x70] sm:$0xff]  ;;  %v53_v16 = vld [vmem:[%s3975_s0 + $0x78] sm:$0xff]  ;;  %v2218_v17 = vld [vmem:[%s3976_s2] ss:$0 sm:$0xff]  ;;  %s3234_s2 = smov 96  }
   0x7   :  { %vm3478_vm2 = vmpackc.low %vm296_vm1, %vm296_vm1 }
   0x8   :  { %2534 = vmatmul.mubr.msk.f32.gmra.mrb[2].mxu0 %vm62_vm0, %v41_v4 }
   0x9   :  { %2536 = vmatprep.mubr.msk.f32.mxu0 %vm62_vm0, %v42_v5 }
   0xc   :  { %2537 = vmatmul.mubr.msk.f32.gmra.mrb[4].mxu0 %vm62_vm0, %v43_v6 }
   0xd   :  { %2539 = vmatprep.mubr.msk.f32.mxu0 %vm62_vm0, %v44_v7 }
  0x10   :  { %2540 = vmatmul.mubr.msk.f32.gmra.mrb[6].mxu0 %vm62_vm0, %v45_v8 }
  0x11   :  { %2542 = vmatprep.mubr.msk.f32.mxu0 %vm62_vm0, %v46_v9 }
  0x14   :  { %2543 = vmatmul.mubr.msk.f32.gmra.mrb[8].mxu0 %vm62_vm0, %v47_v10 }
  0x15   :  { %2545 = vmatprep.mubr.msk.f32.mxu0 %vm62_vm0, %v48_v11 }
  0x18   :  { %2546 = vmatmul.mubr.msk.f32.gmra.mrb[10].mxu0 %vm62_vm0, %v49_v12 }
  0x19   :  { %2548 = vmatprep.mubr.msk.f32.mxu0 %vm62_vm0, %v50_v13 }
  0x1c   :  { %2549 = vmatmul.mubr.msk.f32.gmra.mrb[12].mxu0 %vm62_vm0, %v51_v14 }
  0x1d   :  { %2551 = vmatprep.mubr.msk.f32.mxu0 %vm62_vm0, %v52_v15 }
  0x20   :  { %2552 = vmatmul.mubr.msk.f32.gmra.mrb[14].mxu0 %vm62_vm0, %v53_v16 }
  0xd7   :  { %v2532_v18 = vpop.f32.mrb[0].mxu0 }
  0xd8   :  { %v3366_v19 = vadd.f32 %v2532_v18, %v2218_v17  ;;  %v177_v20 = vpop.f32.mrb[1].mxu0 }
  0xd9   :  { %v3368_v21 = vadd.f32 %v2218_v17, %v177_v20 }
  0xdb   :  { %v3029_v22 = vpack.i.bf16 %v3366_v19, %v3368_v21  ;;  %v2535_v23 = vpop.f32.mrb[2].mxu0 }
  0xdc   :  { %v3372_v24 = vadd.f32 %v2535_v23, %v2218_v17  ;;  %v187_v25 = vpop.f32.mrb[3].mxu0 }
  0xdd   :  { %3030 = vrot.lane.b32.xlu0 %v3029_v22, %s3233_s13  ;;  %v3375_v26 = vadd.f32 %v2218_v17, %v187_v25 }
  0xdf   :  { %v2538_v27 = vpop.f32.mrb[4].mxu0  ;;  %v3379_v28 = vpack.i.bf16 %v3372_v24, %v3375_v26 }
  0xe0   :  { %v3381_v29 = vadd.f32 %v2538_v27, %v2218_v17  ;;  %v197_v30 = vpop.f32.mrb[5].mxu0 }
  0xe1   :  { %v3383_v31 = vadd.f32 %v2218_v17, %v197_v30  ;;  %3035 = vrot.lane.b32.xlu0 %v3379_v28, %s3233_s13 }
  0xe3   :  { %v2541_v32 = vpop.f32.mrb[6].mxu0  ;;  %v3389_v33 = vpack.i.bf16 %v3381_v29, %v3383_v31 }
  0xe4   :  { %v3391_v34 = vadd.f32 %v2541_v32, %v2218_v17  ;;  %v207_v35 = vpop.f32.mrb[7].mxu0 }
  0xe5   :  { %v3393_v36 = vadd.f32 %v2218_v17, %v207_v35  ;;  %3040 = vrot.lane.b32.xlu1 %v3389_v33, %s3233_s13 }
  0xe7   :  { %v2544_v37 = vpop.f32.mrb[8].mxu0  ;;  %v3399_v38 = vpack.i.bf16 %v3391_v34, %v3393_v36 }
  0xe8   :  { %v3401_v39 = vadd.f32 %v2544_v37, %v2218_v17  ;;  %v217_v40 = vpop.f32.mrb[9].mxu0 }
  0xe9   :  { %v3403_v41 = vadd.f32 %v2218_v17, %v217_v40  ;;  %3050 = vrot.lane.b32.xlu0 %v3399_v38, %s3233_s13 }
  0xeb   :  { %v2547_v42 = vpop.f32.mrb[10].mxu0  ;;  %v3409_v43 = vpack.i.bf16 %v3401_v39, %v3403_v41 }
  0xec   :  { %v3411_v44 = vadd.f32 %v2547_v42, %v2218_v17  ;;  %v227_v45 = vpop.f32.mrb[11].mxu0 }
  0xed   :  { %v3413_v46 = vadd.f32 %v2218_v17, %v227_v45  ;;  %3045 = vrot.lane.b32.xlu1 %v3409_v43, %s3233_s13 }
  0xef   :  { %v2550_v47 = vpop.f32.mrb[12].mxu0  ;;  %v3419_v48 = vpack.i.bf16 %v3411_v44, %v3413_v46 }
  0xf0   :  { %v3421_v49 = vadd.f32 %v2550_v47, %v2218_v17  ;;  %v237_v50 = vpop.f32.mrb[13].mxu0 }
  0xf1   :  { %v3423_v51 = vadd.f32 %v2218_v17, %v237_v50  ;;  %3055 = vrot.lane.b32.xlu1 %v3419_v48, %s3233_s13 }
  0xf3   :  { %v3429_v52 = vpack.i.bf16 %v3421_v49, %v3423_v51  ;;  %v2553_v53 = vpop.f32.mrb[14].mxu0 }
  0xf4   :  { %v247_v54 = vpop.f32.mrb[15].mxu0  ;;  %v3435_v55 = vadd.f32 %v2553_v53, %v2218_v17 }
  0xf5   :  { %264 = vrot.lane.b32.xlu1 %v3368_v21, %s3234_s2  ;;  %3060 = vrot.lane.b32.xlu0 %v3429_v52, %s3233_s13  ;;  %v3437_v56 = vadd.f32 %v2218_v17, %v247_v54 }
  0xf7   :  { %v3445_v57 = vpack.i.bf16 %v3435_v55, %v3437_v56 }
  0xf9   :  { %268 = vrot.lane.b32.xlu1 %v3375_v26, %s3234_s2  ;;  %266 = vrot.lane.b32.xlu0 %v3366_v19, %s3234_s2 }
  0xfd   :  { %3065 = vrot.lane.b32.xlu1 %v3445_v57, %s3233_s13  ;;  %270 = vrot.lane.b32.xlu0 %v3372_v24, %s3234_s2 }
 0x101   :  { %274 = vrot.lane.b32.xlu1 %v3381_v29, %s3234_s2  ;;  %272 = vrot.lane.b32.xlu0 %v3383_v31, %s3234_s2 }
 0x105   :  { %278 = vrot.lane.b32.xlu1 %v3391_v34, %s3234_s2  ;;  %276 = vrot.lane.b32.xlu0 %v3393_v36, %s3234_s2 }
 0x109   :  { %444 = vrot.lane.b32.xlu1 %v3401_v39, %s3234_s2  ;;  %442 = vrot.lane.b32.xlu0 %v3403_v41, %s3234_s2 }
 0x10d   :  { %448 = vrot.lane.b32.xlu1 %v3411_v44, %s3234_s2  ;;  %446 = vrot.lane.b32.xlu0 %v3413_v46, %s3234_s2 }
 0x111   :  { %452 = vrot.lane.b32.xlu1 %v3421_v49, %s3234_s2  ;;  %450 = vrot.lane.b32.xlu0 %v3423_v51, %s3234_s2 }
 0x115   :  { %456 = vrot.lane.b32.xlu1 %v3435_v55, %s3234_s2  ;;  %454 = vrot.lane.b32.xlu0 %v3437_v56, %s3234_s2 }
 0x119   :  { %3070 = vrot.lane.b32.xlu1 %v3029_v22, %s3235_s14 }
 0x14f   :  { %v3031_v58 = vpop.permute.xlu0 %3030 }
 0x150   :  { %v3033_v59 = vunpack.i.h.bf16 %v3031_v58  ;;  %v3032_v60 = vunpack.i.l.bf16 %v3031_v58 }
 0x152   :  { %v2834_v62 = vpack.c.bf16 %v3033_v59, %v3032_v60 }
 0x153   :  { %v3036_v63 = vpop.permute.xlu0 %3035 }
 0x154   :  { %2836 = vmatprep.subr.msk.bf16.mxu1 %vm3478_vm2, %v2834_v62  ;;  %v3038_v0 = vunpack.i.h.bf16 %v3036_v63  ;;  %v3037_v1 = vunpack.i.l.bf16 %v3036_v63 }
 0x155   :  { %2839 = vmatpush3.bf16.xpose.msk.msra.mxu1 %vm3478_vm2, %v2834_v62 }
 0x156   :  { %v2840_v2 = vpack.c.bf16 %v3038_v0, %v3037_v1 }
 0x157   :  { %v3041_v3 = vpop.permute.xlu1 %3040 }
 0x158   :  { %v3043_v4 = vunpack.i.h.bf16 %v3041_v3  ;;  %v3042_v5 = vunpack.i.l.bf16 %v3041_v3  ;;  %2842 = vmatprep.subr.msk.bf16.mxu1 %vm3478_vm2, %v2840_v2 }
 0x15a   :  { %v2846_v6 = vpack.c.bf16 %v3043_v4, %v3042_v5 }
 0x15b   :  { %v3051_v7 = vpop.permute.xlu0 %3050 }
 0x15c   :  { %v3053_v8 = vunpack.i.h.bf16 %v3051_v7  ;;  %v3052_v9 = vunpack.i.l.bf16 %v3051_v7 }
 0x15d   :  { %2845 = vmatpush3.bf16.xpose.msk.msra.mxu1 %vm3478_vm2, %v2840_v2 }
 0x15e   :  { %2848 = vmatprep.subr.msk.bf16.mxu1 %vm3478_vm2, %v2846_v6  ;;  %v2852_v14 = vpack.c.bf16 %v3053_v8, %v3052_v9 }
 0x15f   :  { %v3046_v10 = vpop.permute.xlu1 %3045 }
 0x160   :  { %v3048_v11 = vunpack.i.h.bf16 %v3046_v10  ;;  %v3047_v12 = vunpack.i.l.bf16 %v3046_v10 }
 0x162   :  { %v2858_v13 = vpack.c.bf16 %v3048_v11, %v3047_v12 }
 0x163   :  { %v3056_v15 = vpop.permute.xlu1 %3055 }
 0x164   :  { %v3058_v16 = vunpack.i.h.bf16 %v3056_v15  ;;  %v3057_v17 = vunpack.i.l.bf16 %v3056_v15  ;;  %2860 = vmatprep.subr.msk.bf16.mxu0 %vm3478_vm2, %v2858_v13 }
 0x165   :  { %2851 = vmatpush3.bf16.xpose.msk.msra.mxu1 %vm3478_vm2, %v2846_v6  ;;  %2863 = vmatpush3.bf16.xpose.msk.msra.mxu0 %vm3478_vm2, %v2858_v13 }
 0x166   :  { %v2864_v18 = vpack.c.bf16 %v3058_v16, %v3057_v17  ;;  %2854 = vmatprep.subr.msk.bf16.mxu1 %vm3478_vm2, %v2852_v14 }
 0x167   :  { %v265_v20 = vpop.permute.xlu1 %264  ;;  %v3061_v22 = vpop.permute.xlu0 %3060 }
 0x168   :  { %v3063_v23 = vunpack.i.h.bf16 %v3061_v22  ;;  %v3062_v25 = vunpack.i.l.bf16 %v3061_v22  ;;  %2570 = vmatprep.mubr.msk.f32.mxu1 %vm296_vm1, %v265_v20  ;;  %2866 = vmatprep.subr.msk.bf16.mxu0 %vm3478_vm2, %v2864_v18 }
 0x16a   :  { %v2870_v27 = vpack.c.bf16 %v3063_v23, %v3062_v25 }
 0x16b   :  { %v269_v30 = vpop.permute.xlu1 %268  ;;  %v267_v32 = vpop.permute.xlu0 %266 }
 0x16d   :  { %2857 = vmatpush3.bf16.xpose.msk.msra.mxu1 %vm3478_vm2, %v2852_v14  ;;  %2869 = vmatpush3.bf16.xpose.msk.msra.mxu0 %vm3478_vm2, %v2864_v18 }
 0x16e   :  { %2872 = vmatprep.subr.msk.bf16.mxu0 %vm3478_vm2, %v2870_v27 }
 0x16f   :  { %v3066_v35 = vpop.permute.xlu1 %3065  ;;  %v271_v37 = vpop.permute.xlu0 %270 }
 0x170   :  { %v3068_v40 = vunpack.i.h.bf16 %v3066_v35  ;;  %v3067_v42 = vunpack.i.l.bf16 %v3066_v35 }
 0x172   :  { %v2876_v45 = vpack.c.bf16 %v3068_v40, %v3067_v42 }
 0x173   :  { %v275_v47 = vpop.permute.xlu1 %274  ;;  %v273_v50 = vpop.permute.xlu0 %272 }
 0x174   :  { %2571 = vmatmul.mubr.msk.f32.vlgmr.msra.gmra.mrb[0].mxu1 %vm296_vm1, %v267_v32 }
 0x175   :  { %2573 = vmatprep.mubr.msk.f32.mxu1 %vm296_vm1, %v269_v30  ;;  %2875 = vmatpush3.bf16.xpose.msk.msra.mxu0 %vm3478_vm2, %v2870_v27 }
 0x176   :  { %2878 = vmatprep.subr.msk.bf16.mxu0 %vm3478_vm2, %v2876_v45 }
 0x177   :  { %v279_v53 = vpop.permute.xlu1 %278  ;;  %v277_v54 = vpop.permute.xlu0 %276 }
 0x178   :  { %2574 = vmatmul.mubr.msk.f32.gmra.mrb[2].mxu1 %vm296_vm1, %v271_v37 }
 0x179   :  { %2576 = vmatprep.mubr.msk.f32.mxu1 %vm296_vm1, %v273_v50 }
 0x17b   :  { %v445_v58 = vpop.permute.xlu1 %444  ;;  %v443_v59 = vpop.permute.xlu0 %442 }
 0x17c   :  { %2577 = vmatmul.mubr.msk.f32.gmra.mrb[4].mxu1 %vm296_vm1, %v275_v47  ;;  %2598 = vmatprep.mubr.msk.f32.mxu0 %vm296_vm1, %v443_v59 }
 0x17d   :  { %2579 = vmatprep.mubr.msk.f32.mxu1 %vm296_vm1, %v277_v54  ;;  %2881 = vmatpush3.bf16.xpose.msk.msra.mxu0 %vm3478_vm2, %v2876_v45 }
 0x17f   :  { %v449_v60 = vpop.permute.xlu1 %448  ;;  %v447_v62 = vpop.permute.xlu0 %446 }
 0x180   :  { %2580 = vmatmul.mubr.msk.f32.gmra.mrb[6].mxu1 %vm296_vm1, %v279_v53 }
 0x183   :  { %v453_v63 = vpop.permute.xlu1 %452  ;;  %v451_v0 = vpop.permute.xlu0 %450 }
 0x184   :  { %2599 = vmatmul.mubr.msk.f32.vlgmr.msra.gmra.mrb[16].mxu0 %vm296_vm1, %v445_v58 }
 0x185   :  { %2601 = vmatprep.mubr.msk.f32.mxu0 %vm296_vm1, %v447_v62 }
 0x187   :  { %v457_v1 = vpop.permute.xlu1 %456  ;;  %v455_v3 = vpop.permute.xlu0 %454 }
 0x188   :  { %2602 = vmatmul.mubr.msk.f32.gmra.mrb[18].mxu0 %vm296_vm1, %v449_v60 }
 0x189   :  { %2604 = vmatprep.mubr.msk.f32.mxu0 %vm296_vm1, %v451_v0 }
 0x18b   :  { %v3071_v2 = vpop.permute.xlu1 %3070 }
 0x18c   :  { %v3073_v4 = vunpack.i.h.bf16 %v3071_v2  ;;  %v3072_v5 = vunpack.i.l.bf16 %v3071_v2  ;;  %2605 = vmatmul.mubr.msk.f32.gmra.mrb[20].mxu0 %vm296_vm1, %v453_v63 }
 0x18d   :  { %2607 = vmatprep.mubr.msk.f32.mxu0 %vm296_vm1, %v455_v3 }
 0x18e   :  { %v2882_v6 = vpack.c.bf16 %v3073_v4, %v3072_v5 }
 0x190   :  { %2608 = vmatmul.mubr.msk.f32.gmra.mrb[22].mxu0 %vm296_vm1, %v457_v1  ;;  %2883 = vmatprep.subr.bf16.mxu1 %v2882_v6 }
 0x191   :  { %2885 = vmatpush3.bf16.msra.mxu1 %v2882_v6 }
 0x247   :  { %v2572_v7 = vpop.f32.mrb[0].mxu1 }
 0x248   :  { %v395_v8 = vpop.f32.mrb[1].mxu1  ;;  %v615_v9 = vsel %vm611_vm3, %v2572_v7, -inf }
 0x249   :  { %616 = vmax.xlane.f32.xlu1 %v615_v9  ;;  %v612_v10 = vsel %vm611_vm3, %v395_v8, -inf }
 0x24a   :  { %613 = vmax.xlane.f32.xlu0 %v612_v10 }
 0x24b   :  { %v2575_v11 = vpop.f32.mrb[2].mxu1 }
 0x24c   :  { %v405_v12 = vpop.f32.mrb[3].mxu1  ;;  %v621_v13 = vsel %vm611_vm3, %v2575_v11, -inf }
 0x24d   :  { %v618_v16 = vsel %vm611_vm3, %v405_v12, -inf }
 0x24e   :  { %622 = vmax.xlane.f32.xlu0 %v621_v13 }
 0x24f   :  { %v3533_v14 = vpop.f32.mrb[4].mxu1 }
 0x250   :  { %v415_v15 = vpop.f32.mrb[5].mxu1  ;;  %v627_v22 = vsel %vm611_vm3, %v3533_v14, -inf }
 0x251   :  { %v624_v17 = vsel %vm611_vm3, %v415_v15, -inf }
 0x252   :  { %619 = vmax.xlane.f32.xlu0 %v618_v16  ;;  %625 = vmax.xlane.f32.xlu1 %v624_v17 }
 0x253   :  { %v3537_v18 = vpop.f32.mrb[6].mxu1 }
 0x254   :  { %v3539_v20 = vpop.f32.mrb[7].mxu1  ;;  %v633_v30 = vsel %vm611_vm3, %v3537_v18, -inf }
 0x255   :  { %v630_v23 = vsel %vm611_vm3, %v3539_v20, -inf }
 0x256   :  { %628 = vmax.xlane.f32.xlu0 %v627_v22  ;;  %631 = vmax.xlane.f32.xlu1 %v630_v23 }
 0x257   :  { %v3545_v25 = vpop.f32.mrb[16].mxu0 }
 0x258   :  { %v3547_v27 = vpop.f32.mrb[17].mxu0  ;;  %v639_v37 = vsel %vm611_vm3, %v3545_v25, -inf }
 0x259   :  { %v636_v50 = vsel %vm611_vm3, %v3547_v27, -inf }
 0x25a   :  { %634 = vmax.xlane.f32.xlu0 %v633_v30 }
 0x25b   :  { %v3551_v32 = vpop.f32.mrb[18].mxu0 }
 0x25c   :  { %v3553_v35 = vpop.f32.mrb[19].mxu0  ;;  %v645_v54 = vsel %vm611_vm3, %v3551_v32, -inf }
 0x25d   :  { %v642_v53 = vsel %vm611_vm3, %v3553_v35, -inf }
 0x25e   :  { %640 = vmax.xlane.f32.xlu0 %v639_v37 }
 0x25f   :  { %v3557_v40 = vpop.f32.mrb[20].mxu0 }
 0x260   :  { %v3559_v42 = vpop.f32.mrb[21].mxu0 }
 0x261   :  { %v648_v58 = vsel %vm611_vm3, %v3559_v42, -inf }
 0x263   :  { %v3561_v45 = vpop.f32.mrb[22].mxu0 }
 0x264   :  { %v3563_v47 = vpop.f32.mrb[23].mxu0  ;;  %v657_v59 = vsel %vm611_vm3, %v3561_v45, -inf }
 0x267   :  { %3080 = vrot.lane.b32.xlu1 %v3389_v33, %s3235_s14  ;;  %v651_v33 = vsel %vm611_vm3, %v3557_v40, -inf }
 0x274   :  { %3075 = vrot.lane.b32.xlu0 %v3379_v28, %s3235_s14  ;;  %v654_v28 = vsel %vm611_vm3, %v3563_v47, -inf }
 0x28b   :  { %637 = vmax.xlane.f32.xlu1 %v636_v50 }
 0x28f   :  { %643 = vmax.xlane.f32.xlu1 %v642_v53 }
 0x293   :  { %646 = vmax.xlane.f32.xlu0 %v645_v54  ;;  %649 = vmax.xlane.f32.xlu1 %v648_v58 }
 0x297   :  { %652 = vmax.xlane.f32.xlu0 %v651_v33  ;;  %655 = vmax.xlane.f32.xlu1 %v654_v28 }
 0x29b   :  { %658 = vmax.xlane.f32.xlu0 %v657_v59 }
 0x2d6   :  { %v617_v60 = vpop.xlane.xlu1 %616 }
 0x2d7   :  { %v661_v62 = vsub.f32 %v2572_v7, %v617_v60  ;;  %v614_v63 = vpop.xlane.xlu0 %613 }
 0x2d8   :  { %v660_v0 = vsub.f32 %v395_v8, %v614_v63 }
 0x2d9   :  { %v678_v1 = vmul.f32 1.442695, %v661_v62 }
 0x2da   :  { %v676_v2 = vmul.f32 1.442695, %v660_v0 }
 0x2db   :  { %3149 = vpow2.f32 %v678_v1  ;;  %v623_v3 = vpop.xlane.xlu0 %622 }
 0x2dc   :  { %3151 = vpow2.f32 %v676_v2  ;;  %v663_v4 = vsub.f32 %v2575_v11, %v623_v3 }
 0x2de   :  { %v682_v5 = vmul.f32 1.442695, %v663_v4 }
 0x2df   :  { %v620_v6 = vpop.xlane.xlu0 %619  ;;  %v626_v9 = vpop.xlane.xlu1 %625 }
 0x2e0   :  { %3153 = vpow2.f32 %v682_v5  ;;  %v662_v10 = vsub.f32 %v405_v12, %v620_v6  ;;  %v664_v13 = vsub.f32 %v415_v15, %v626_v9 }
 0x2e2   :  { %v680_v16 = vmul.f32 1.442695, %v662_v10  ;;  %v684_v17 = vmul.f32 1.442695, %v664_v13 }
 0x2e3   :  { %v629_v22 = vpop.xlane.xlu0 %628  ;;  %v632_v23 = vpop.xlane.xlu1 %631 }
 0x2e4   :  { %3155 = vpow2.f32 %v680_v16  ;;  %v665_v7 = vsub.f32 %v3533_v14, %v629_v22  ;;  %v666_v11 = vsub.f32 %v3539_v20, %v632_v23 }
 0x2e5   :  { %v3584_v8 = vpop.eup %3149  ;;  %3157 = vpow2.f32 %v684_v17 }
 0x2e6   :  { %v3586_v30 = vpop.eup %3151  ;;  %v686_v37 = vmul.f32 1.442695, %v665_v7  ;;  %v711_v50 = vsel %vm611_vm3, %v3584_v8, 0.0  ;;  %v688_v54 = vmul.f32 1.442695, %v666_v11 }
 0x2e7   :  { %712 = vadd.xlane.f32.xlu0 %v711_v50  ;;  %v635_v12 = vpop.xlane.xlu0 %634  ;;  %v708_v15 = vsel %vm611_vm3, %v3586_v30, 0.0  ;;  %v3081_v59 = vpop.permute.xlu1 %3080 }
 0x2e8   :  { %3159 = vpow2.f32 %v686_v37  ;;  %v667_v53 = vsub.f32 %v3537_v18, %v635_v12  ;;  %709 = vadd.xlane.f32.xlu1 %v708_v15  ;;  %v3083_v0 = vunpack.i.h.bf16 %v3081_v59  ;;  %v3082_v1 = vunpack.i.l.bf16 %v3081_v59 }
 0x2ea   :  { %v3594_v14 = vpop.eup %3153  ;;  %v690_v58 = vmul.f32 1.442695, %v667_v53  ;;  %v2890_v9 = vpack.c.bf16 %v3083_v0, %v3082_v1 }
 0x2eb   :  { %v641_v33 = vpop.xlane.xlu0 %640  ;;  %v717_v20 = vsel %vm611_vm3, %v3594_v14, 0.0 }
 0x2ec   :  { %3161 = vpow2.f32 %v690_v58  ;;  %v669_v28 = vsub.f32 %v3545_v25, %v641_v33  ;;  %718 = vadd.xlane.f32.xlu0 %v717_v20 }
 0x2ed   :  { %3163 = vpow2.f32 %v688_v54 }
 0x2ee   :  { %v3599_v60 = vpop.eup %3155  ;;  %v694_v62 = vmul.f32 1.442695, %v669_v28 }
 0x2ef   :  { %v3076_v63 = vpop.permute.xlu0 %3075  ;;  %v714_v18 = vsel %vm611_vm3, %v3599_v60, 0.0  ;;  %v3603_v4 = vpop.eup %3157 }
 0x2f0   :  { %v3078_v2 = vunpack.i.h.bf16 %v3076_v63  ;;  %v3077_v3 = vunpack.i.l.bf16 %v3076_v63  ;;  %715 = vadd.xlane.f32.xlu1 %v714_v18  ;;  %3165 = vpow2.f32 %v694_v62  ;;  %v720_v10 = vsel %vm611_vm3, %v3603_v4, 0.0 }
 0x2f2   :  { %v3605_v5 = vpop.eup %3159  ;;  %v2886_v25 = vpack.c.bf16 %v3078_v2, %v3077_v3 }
 0x2f3   :  { %v723_v6 = vsel %vm611_vm3, %v3605_v5, 0.0 }
 0x2f4   :  { %724 = vadd.xlane.f32.xlu0 %v723_v6  ;;  %2887 = vmatprep.subr.bf16.mxu1 %v2886_v25 }
 0x2f5   :  { %721 = vadd.xlane.f32.xlu1 %v720_v10  ;;  %2889 = vmatpush3.bf16.msra.mxu1 %v2886_v25 }
 0x2f6   :  { %v3611_v13 = vpop.eup %3161  ;;  %2891 = vmatprep.subr.bf16.mxu1 %v2890_v9 }
 0x2f7   :  { %v729_v16 = vsel %vm611_vm3, %v3611_v13, 0.0  ;;  %v3615_v17 = vpop.eup %3163 }
 0x2f8   :  { %730 = vadd.xlane.f32.xlu0 %v729_v16  ;;  %v726_v22 = vsel %vm611_vm3, %v3615_v17, 0.0 }
 0x2f9   :  { %2893 = vmatpush3.bf16.msra.mxu1 %v2890_v9 }
 0x2fa   :  { %v3619_v23 = vpop.eup %3165 }
 0x2fb   :  { %v735_v7 = vsel %vm611_vm3, %v3619_v23, 0.0 }
 0x2fc   :  { %727 = vadd.xlane.f32.xlu0 %v726_v22 }
 0x300   :  { %736 = vadd.xlane.f32.xlu0 %v735_v7 }
 0x306   :  { %3090 = vrot.lane.b32.xlu1 %v3409_v43, %s3235_s14 }
 0x30a   :  { %3095 = vrot.lane.b32.xlu1 %v3419_v48, %s3235_s14 }
 0x30e   :  { %3100 = vrot.lane.b32.xlu1 %v3429_v52, %s3235_s14 }
 0x316   :  { %3085 = vrot.lane.b32.xlu0 %v3399_v38, %s3235_s14 }
 0x318   :  { %v638_v37 = vpop.xlane.xlu1 %637 }
 0x319   :  { %v668_v11 = vsub.f32 %v3547_v27, %v638_v37 }
 0x31b   :  { %v692_v15 = vmul.f32 1.442695, %v668_v11 }
 0x31c   :  { %v644_v50 = vpop.xlane.xlu1 %643 }
 0x31d   :  { %v670_v12 = vsub.f32 %v3553_v35, %v644_v50  ;;  %3167 = vpow2.f32 %v692_v15 }
 0x31f   :  { %v696_v58 = vmul.f32 1.442695, %v670_v12 }
 0x320   :  { %v647_v53 = vpop.xlane.xlu0 %646  ;;  %v650_v54 = vpop.xlane.xlu1 %649 }
 0x321   :  { %v672_v43 = vsub.f32 %v3559_v42, %v650_v54  ;;  %3169 = vpow2.f32 %v696_v58  ;;  %v671_v2 = vsub.f32 %v3551_v32, %v647_v53 }
 0x323   :  { %v700_v33 = vmul.f32 1.442695, %v672_v43  ;;  %v698_v25 = vmul.f32 1.442695, %v671_v2  ;;  %v1095_v2 = vld [vmem:[%s3977_s3 + $0x8] sm:$0xff] }
 0x324   :  { %v653_v48 = vpop.xlane.xlu0 %652  ;;  %v656_v3 = vpop.xlane.xlu1 %655 }
 0x325   :  { %v673_v52 = vsub.f32 %v3557_v40, %v653_v48  ;;  %3171 = vpow2.f32 %v700_v33  ;;  %v674_v6 = vsub.f32 %v3563_v47, %v656_v3 }
 0x327   :  { %v702_v38 = vmul.f32 1.442695, %v673_v52  ;;  %v3636_v28 = vpop.eup %3167  ;;  %v704_v9 = vmul.f32 1.442695, %v674_v6 }
 0x328   :  { %v659_v20 = vpop.xlane.xlu0 %658  ;;  %v732_v42 = vsel %vm611_vm3, %v3636_v28, 0.0 }
 0x329   :  { %v675_v27 = vsub.f32 %v3561_v45, %v659_v20  ;;  %3173 = vpow2.f32 %v702_v38 }
 0x32b   :  { %v706_v35 = vmul.f32 1.442695, %v675_v27  ;;  %v3638_v59 = vpop.eup %3169 }
 0x32c   :  { %v738_v62 = vsel %vm611_vm3, %v3638_v59, 0.0 }
 0x32d   :  { %3175 = vpow2.f32 %v706_v35 }
 0x32e   :  { %3177 = vpow2.f32 %v698_v25 }
 0x32f   :  { %v3644_v40 = vpop.eup %3171  ;;  %3179 = vpow2.f32 %v704_v9 }
 0x330   :  { %v744_v45 = vsel %vm611_vm3, %v3644_v40, 0.0 }
 0x332   :  { %733 = vadd.xlane.f32.xlu1 %v732_v42 }
 0x333   :  { %v3648_v63 = vpop.eup %3173 }
 0x334   :  { %v747_v18 = vsel %vm611_vm3, %v3648_v63, 0.0 }
 0x335   :  { %739 = vadd.xlane.f32.xlu0 %v738_v62 }
 0x337   :  { %v3652_v0 = vpop.eup %3175 }
 0x338   :  { %v753_v1 = vsel %vm611_vm3, %v3652_v0, 0.0  ;;  %v3660_v10 = vpop.eup %3177 }
 0x339   :  { %745 = vadd.xlane.f32.xlu0 %v744_v45  ;;  %v741_v16 = vsel %vm611_vm3, %v3660_v10, 0.0  ;;  %v3664_v22 = vpop.eup %3179 }
 0x33d   :  { %748 = vadd.xlane.f32.xlu0 %v747_v18 }
 0x341   :  { %754 = vadd.xlane.f32.xlu0 %v753_v1  ;;  %v1094_v1 = vld [vmem:[%s3977_s3] sm:$0xff] }
 0x342   :  { %v2914_v9 = vpack.c.bf16 %v1095_v2, %v1094_v1 }
 0x343   :  { %3105 = vrot.lane.b32.xlu1 %v3445_v57, %s3235_s14  ;;  %v750_v57 = vsel %vm611_vm3, %v3664_v22, 0.0 }
 0x367   :  { %742 = vadd.xlane.f32.xlu1 %v741_v16 }
 0x36b   :  { %751 = vadd.xlane.f32.xlu1 %v750_v57  ;;  %v1096_v57 = vld [vmem:[%s3977_s3 + $0x10] sm:$0xff] }
 0x374   :  { %v713_v7 = vpop.xlane.xlu0 %712 }
 0x375   :  { %v710_v32 = vpop.xlane.xlu1 %709 }
 0x376   :  { %3181 = vrcp.f32 %v710_v32  ;;  %v1097_v32 = vld [vmem:[%s3977_s3 + $0x18] sm:$0xff] }
 0x377   :  { %3183 = vrcp.f32 %v713_v7 }
 0x379   :  { %v719_v37 = vpop.xlane.xlu0 %718 }
 0x37d   :  { %v716_v47 = vpop.xlane.xlu1 %715 }
 0x37e   :  { %3185 = vrcp.f32 %v716_v47  ;;  %v2918_v47 = vpack.c.bf16 %v1097_v32, %v1096_v57 }
 0x37f   :  { %3187 = vrcp.f32 %v719_v37 }
 0x380   :  { %v3182_v11 = vpop.eup %3181 }
 0x381   :  { %v725_v50 = vpop.xlane.xlu0 %724  ;;  %v772_v12 = vmul.f32 %v3182_v11, %v3586_v30  ;;  %v3184_v16 = vpop.eup %3183 }
 0x382   :  { %v722_v15 = vpop.xlane.xlu1 %721  ;;  %v773_v37 = vmul.f32 %v3184_v16, %v3584_v8 }
 0x383   :  { %2626 = vmatprep.mubr.msk.f32.mxu1 %vm611_vm3, %v772_v12  ;;  %3189 = vrcp.f32 %v722_v15 }
 0x384   :  { %3191 = vrcp.f32 %v725_v50 }
 0x385   :  { %v731_v53 = vpop.xlane.xlu0 %730 }
 0x386   :  { %v3091_v54 = vpop.permute.xlu1 %3090 }
 0x387   :  { %v3093_v58 = vunpack.i.h.bf16 %v3091_v54  ;;  %v3092_v43 = vunpack.i.l.bf16 %v3091_v54 }
 0x388   :  { %v3186_v7 = vpop.eup %3185 }
 0x389   :  { %v2898_v48 = vpack.c.bf16 %v3093_v58, %v3092_v43  ;;  %v728_v33 = vpop.xlane.xlu0 %727  ;;  %v3188_v11 = vpop.eup %3187  ;;  %v774_v50 = vmul.f32 %v3186_v7, %v3599_v60 }
 0x38a   :  { %v3096_v52 = vpop.permute.xlu1 %3095  ;;  %3193 = vrcp.f32 %v728_v33  ;;  %v775_v15 = vmul.f32 %v3188_v11, %v3594_v14 }
 0x38b   :  { %v3098_v20 = vunpack.i.h.bf16 %v3096_v52  ;;  %v3097_v38 = vunpack.i.l.bf16 %v3096_v52  ;;  %2899 = vmatprep.subr.bf16.mxu0 %v2898_v48  ;;  %3195 = vrcp.f32 %v731_v53 }
 0x38c   :  { %2901 = vmatpush3.bf16.msra.mxu0 %v2898_v48 }
 0x38d   :  { %v2902_v27 = vpack.c.bf16 %v3098_v20, %v3097_v38  ;;  %v737_v35 = vpop.xlane.xlu0 %736  ;;  %v3190_v12 = vpop.eup %3189 }
 0x38e   :  { %v3101_v42 = vpop.permute.xlu1 %3100  ;;  %v3192_v54 = vpop.eup %3191  ;;  %v776_v53 = vmul.f32 %v3190_v12, %v3603_v4  ;;  %3197 = vrcp.f32 %v737_v35 }
 0x38f   :  { %v3103_v30 = vunpack.i.h.bf16 %v3101_v42  ;;  %v3102_v62 = vunpack.i.l.bf16 %v3101_v42  ;;  %2903 = vmatprep.subr.bf16.mxu0 %v2902_v27  ;;  %v777_v8 = vmul.f32 %v3192_v54, %v3605_v5  ;;  %v1316_v54 = vld [vmem:[%s3978_s5 + $0x10] sm:$0xff] }
 0x390   :  { %2905 = vmatpush3.bf16.msra.mxu0 %v2902_v27 }
 0x391   :  { %v2906_v45 = vpack.c.bf16 %v3103_v30, %v3102_v62  ;;  %v3086_v18 = vpop.permute.xlu0 %3085 }
 0x392   :  { %v3088_v3 = vunpack.i.h.bf16 %v3086_v18  ;;  %v3087_v25 = vunpack.i.l.bf16 %v3086_v18 }
 0x393   :  { %2907 = vmatprep.subr.bf16.mxu0 %v2906_v45 }
 0x394   :  { %v2894_v6 = vpack.c.bf16 %v3088_v3, %v3087_v25  ;;  %2909 = vmatpush3.bf16.msra.mxu0 %v2906_v45  ;;  %v3194_v58 = vpop.eup %3193 }
 0x395   :  { %v3196_v60 = vpop.eup %3195  ;;  %v778_v43 = vmul.f32 %v3194_v58, %v3615_v17 }
 0x396   :  { %2895 = vmatprep.subr.bf16.mxu1 %v2894_v6  ;;  %v779_v14 = vmul.f32 %v3196_v60, %v3611_v13 }
 0x397   :  { %2897 = vmatpush3.bf16.msra.mxu1 %v2894_v6 }
 0x398   :  { %2915 = vmatprep.subr.bf16.mxu1 %v2914_v9  ;;  %v3198_v38 = vpop.eup %3197 }
 0x399   :  { %v781_v42 = vmul.f32 %v3198_v38, %v3619_v23 }
 0x39a   :  { %2627 = vmatmul.mubr.msk.f32.vlgmr.msra.gmra.mrb[8].mxu1 %vm611_vm3, %v773_v37 }
 0x39b   :  { %2629 = vmatprep.mubr.msk.f32.mxu1 %vm611_vm3, %v774_v50  ;;  %2917 = vmatpush3.bf16.msra.mxu1 %v2914_v9 }
 0x39c   :  { %2919 = vmatprep.subr.bf16.mxu1 %v2918_v47 }
 0x39e   :  { %2630 = vmatmul.mubr.msk.f32.gmra.mrb[10].mxu1 %vm611_vm3, %v775_v15 }
 0x39f   :  { %2632 = vmatprep.mubr.msk.f32.mxu1 %vm611_vm3, %v776_v53  ;;  %2921 = vmatpush3.bf16.msra.mxu1 %v2918_v47  ;;  %v1317_v53 = vld [vmem:[%s3978_s5 + $0x18] sm:$0xff] }
 0x3a0   :  { %v2926_v58 = vpack.c.bf16 %v1317_v53, %v1316_v54 }
 0x3a2   :  { %2633 = vmatmul.mubr.msk.f32.gmra.mrb[12].mxu1 %vm611_vm3, %v777_v8 }
 0x3a3   :  { %2635 = vmatprep.mubr.msk.f32.mxu1 %vm611_vm3, %v778_v43 }
 0x3a6   :  { %2636 = vmatmul.mubr.msk.f32.gmra.mrb[14].mxu1 %vm611_vm3, %v779_v14 }
 0x3bf   :  { %v734_v4 = vpop.xlane.xlu1 %733 }
 0x3c0   :  { %3199 = vrcp.f32 %v734_v4 }
 0x3c2   :  { %v740_v48 = vpop.xlane.xlu0 %739 }
 0x3c3   :  { %3201 = vrcp.f32 %v740_v48  ;;  %v3106_v33 = vpop.permute.xlu1 %3105 }
 0x3c4   :  { %v3108_v52 = vunpack.i.h.bf16 %v3106_v33  ;;  %v3107_v20 = vunpack.i.l.bf16 %v3106_v33  ;;  %v2283_v33 = vld [vmem:[%s3979_s4] ss:$0 sm:$0xff] }
 0x3c6   :  { %v2910_v5 = vpack.c.bf16 %v3108_v52, %v3107_v20  ;;  %v746_v30 = vpop.xlane.xlu0 %745 }
 0x3c7   :  { %3203 = vrcp.f32 %v746_v30 }
 0x3c8   :  { %2911 = vmatprep.subr.bf16.mxu0 %v2910_v5 }
 0x3c9   :  { %2913 = vmatpush3.bf16.msra.mxu0 %v2910_v5 }
 0x3ca   :  { %v3200_v17 = vpop.eup %3199  ;;  %v749_v62 = vpop.xlane.xlu0 %748 }
 0x3cb   :  { %v780_v27 = vmul.f32 %v3200_v17, %v3636_v28 }
 0x3cd   :  { %v3202_v13 = vpop.eup %3201  ;;  %2654 = vmatprep.mubr.msk.f32.mxu0 %vm611_vm3, %v780_v27 }
 0x3ce   :  { %2655 = vmatmul.mubr.msk.f32.vlgmr.msra.gmra.mrb[24].mxu0 %vm611_vm3, %v781_v42  ;;  %v782_v35 = vmul.f32 %v3202_v13, %v3638_v59  ;;  %v755_v18 = vpop.xlane.xlu0 %754 }
 0x3d0   :  { %2657 = vmatprep.mubr.msk.f32.mxu0 %vm611_vm3, %v782_v35 }
 0x3d1   :  { %v3204_v23 = vpop.eup %3203 }
 0x3d2   :  { %v784_v25 = vmul.f32 %v3204_v23, %v3644_v40  ;;  %v1314_v40 = vld [vmem:[%s3978_s5] sm:$0xff] }
 0x3f4   :  { %v743_v45 = vpop.xlane.xlu1 %742 }
 0x3f5   :  { %3205 = vrcp.f32 %v743_v45 }
 0x3f6   :  { %3207 = vrcp.f32 %v749_v62 }
 0x3f8   :  { %v752_v1 = vpop.xlane.xlu1 %751 }
 0x3f9   :  { %3209 = vrcp.f32 %v752_v1 }
 0x3fa   :  { %3211 = vrcp.f32 %v755_v18 }
 0x3ff   :  { %v3206_v28 = vpop.eup %3205 }
 0x400   :  { %v783_v2 = vmul.f32 %v3206_v28, %v3660_v10  ;;  %v3208_v3 = vpop.eup %3207  ;;  %v1315_v10 = vld [vmem:[%s3978_s5 + $0x8] sm:$0xff] }
 0x401   :  { %v785_v6 = vmul.f32 %v3208_v3, %v3648_v63  ;;  %v2922_v63 = vpack.c.bf16 %v1315_v10, %v1314_v40 }
 0x402   :  { %2658 = vmatmul.mubr.msk.f32.gmra.mrb[26].mxu0 %vm611_vm3, %v783_v2 }
 0x403   :  { %v3210_v59 = vpop.eup %3209  ;;  %2660 = vmatprep.mubr.msk.f32.mxu0 %vm611_vm3, %v784_v25  ;;  %2923 = vmatprep.subr.bf16.mxu0 %v2922_v63 }
 0x404   :  { %v786_v9 = vmul.f32 %v3210_v59, %v3664_v22  ;;  %v3212_v16 = vpop.eup %3211  ;;  %2925 = vmatpush3.bf16.msra.mxu0 %v2922_v63 }
 0x405   :  { %v787_v57 = vmul.f32 %v3212_v16, %v3652_v0  ;;  %2927 = vmatprep.subr.bf16.mxu0 %v2926_v58 }
 0x406   :  { %2661 = vmatmul.mubr.msk.f32.gmra.mrb[28].mxu0 %vm611_vm3, %v785_v6 }
 0x407   :  { %2663 = vmatprep.mubr.msk.f32.mxu0 %vm611_vm3, %v786_v9 }
 0x408   :  { %2929 = vmatpush3.bf16.msra.mxu0 %v2926_v58 }
 0x40a   :  { %2664 = vmatmul.mubr.msk.f32.gmra.mrb[30].mxu0 %vm611_vm3, %v787_v57 }
 0x46d   :  { %v2628_v22 = vpop.f32.mrb[8].mxu1 }
 0x46e   :  { %v902_v32 = vpop.f32.mrb[9].mxu1 }
 0x46f   :  { %2674 = vmatprep.mubr.msk.f32.mxu1 %vm296_vm1, %v902_v32 }
 0x470   :  { %2675 = vmatmul.mubr.msk.f32.vlgmr.msra.gmra.mrb[16].mxu1 %vm296_vm1, %v2628_v22 }
 0x471   :  { %v2631_v0 = vpop.f32.mrb[10].mxu1 }
 0x472   :  { %v912_v7 = vpop.f32.mrb[11].mxu1 }
 0x473   :  { %2677 = vmatprep.mubr.msk.f32.mxu1 %vm296_vm1, %v912_v7 }
 0x474   :  { %2678 = vmatmul.mubr.msk.f32.gmra.mrb[18].mxu1 %vm296_vm1, %v2631_v0 }
 0x475   :  { %v2634_v37 = vpop.f32.mrb[12].mxu1 }
 0x476   :  { %v922_v47 = vpop.f32.mrb[13].mxu1 }
 0x477   :  { %2680 = vmatprep.mubr.msk.f32.mxu1 %vm296_vm1, %v922_v47 }
 0x478   :  { %2681 = vmatmul.mubr.msk.f32.gmra.mrb[20].mxu1 %vm296_vm1, %v2634_v37 }
 0x479   :  { %v2637_v11 = vpop.f32.mrb[14].mxu1 }
 0x47a   :  { %v932_v50 = vpop.f32.mrb[15].mxu1 }
 0x47b   :  { %2683 = vmatprep.mubr.msk.f32.mxu1 %vm296_vm1, %v932_v50 }
 0x47c   :  { %2684 = vmatmul.mubr.msk.f32.gmra.mrb[22].mxu1 %vm296_vm1, %v2637_v11 }
 0x4a1   :  { %v2656_v12 = vpop.f32.mrb[24].mxu0 }
 0x4a2   :  { %v1055_v15 = vpop.f32.mrb[25].mxu0 }
 0x4a3   :  { %2686 = vmatprep.mubr.msk.f32.mxu1 %vm296_vm1, %v1055_v15 }
 0x4a4   :  { %2687 = vmatmul.mubr.msk.f32.gmra.mrb[24].mxu1 %vm296_vm1, %v2656_v12 }
 0x4d5   :  { %v2659_v8 = vpop.f32.mrb[26].mxu0 }
 0x4d6   :  { %v1065_v60 = vpop.f32.mrb[27].mxu0 }
 0x4d7   :  { %2689 = vmatprep.mubr.msk.f32.mxu1 %vm296_vm1, %v1065_v60 }
 0x4d8   :  { %2690 = vmatmul.mubr.msk.f32.gmra.mrb[26].mxu1 %vm296_vm1, %v2659_v8 }
 0x4d9   :  { %v2662_v43 = vpop.f32.mrb[28].mxu0 }
 0x4da   :  { %v1075_v14 = vpop.f32.mrb[29].mxu0 }
 0x4db   :  { %2692 = vmatprep.mubr.msk.f32.mxu1 %vm296_vm1, %v1075_v14 }
 0x4dc   :  { %2693 = vmatmul.mubr.msk.f32.gmra.mrb[28].mxu1 %vm296_vm1, %v2662_v43 }
 0x4dd   :  { %v2665_v4 = vpop.f32.mrb[30].mxu0 }
 0x4de   :  { %v1085_v48 = vpop.f32.mrb[31].mxu0 }
 0x4df   :  { %2695 = vmatprep.mubr.msk.f32.mxu1 %vm296_vm1, %v1085_v48 }
 0x4e0   :  { %2696 = vmatmul.mubr.msk.f32.gmra.mrb[30].mxu1 %vm296_vm1, %v2665_v4 }
 0x543   :  { %v2676_v52 = vpop.f32.mrb[16].mxu1 }
 0x544   :  { %v1225_v20 = vadd.f32 %v2676_v52, %v2283_v33  ;;  %v1219_v5 = vpop.f32.mrb[17].mxu1 }
 0x545   :  { %v1220_v38 = vadd.f32 %v2283_v33, %v1219_v5 }
 0x546   :  { %v3747_v42 = vadd.f32 %v1225_v20, %v3366_v19 }
 0x547   :  { %v3744_v17 = vadd.f32 %v1220_v38, %v3368_v21  ;;  %v2679_v27 = vpop.f32.mrb[18].mxu1 }
 0x548   :  { %v1235_v13 = vadd.f32 %v2679_v27, %v2283_v33  ;;  %v1229_v35 = vpop.f32.mrb[19].mxu1 }
 0x549   :  { %v1230_v30 = vadd.f32 %v2283_v33, %v1229_v35  ;;  %2706 = vmatprep.mubr.msk.f32.mxu0 %vm296_vm1, %v3744_v17 }
 0x54a   :  { %2707 = vmatmul.mubr.msk.f32.vlgmr.msra.gmra.mrb[32].mxu0 %vm296_vm1, %v3747_v42  ;;  %v1301_v18 = vadd.f32 %v1235_v13, %v3372_v24 }
 0x54b   :  { %v1300_v62 = vadd.f32 %v1230_v30, %v3375_v26  ;;  %v2682_v45 = vpop.f32.mrb[20].mxu1 }
 0x54c   :  { %v1245_v21 = vadd.f32 %v2682_v45, %v2283_v33  ;;  %v1239_v1 = vpop.f32.mrb[21].mxu1 }
 0x54d   :  { %v1240_v23 = vadd.f32 %v2283_v33, %v1239_v1  ;;  %2709 = vmatprep.mubr.msk.f32.mxu0 %vm296_vm1, %v1300_v62 }
 0x54e   :  { %2710 = vmatmul.mubr.msk.f32.gmra.mrb[34].mxu0 %vm296_vm1, %v1301_v18  ;;  %v1303_v2 = vadd.f32 %v1245_v21, %v3381_v29 }
 0x54f   :  { %v1302_v19 = vadd.f32 %v1240_v23, %v3383_v31  ;;  %v2685_v28 = vpop.f32.mrb[22].mxu1 }
 0x550   :  { %v1255_v3 = vadd.f32 %v2685_v28, %v2283_v33  ;;  %v1249_v25 = vpop.f32.mrb[23].mxu1 }
 0x551   :  { %v1250_v59 = vadd.f32 %v2283_v33, %v1249_v25  ;;  %2712 = vmatprep.mubr.msk.f32.mxu0 %vm296_vm1, %v1302_v19 }
 0x552   :  { %2713 = vmatmul.mubr.msk.f32.gmra.mrb[36].mxu0 %vm296_vm1, %v1303_v2  ;;  %v1305_v26 = vadd.f32 %v1255_v3, %v3391_v34 }
 0x553   :  { %v1304_v24 = vadd.f32 %v1250_v59, %v3393_v36 }
 0x555   :  { %2715 = vmatprep.mubr.msk.f32.mxu0 %vm296_vm1, %v1304_v24 }
 0x556   :  { %2716 = vmatmul.mubr.msk.f32.gmra.mrb[38].mxu0 %vm296_vm1, %v1305_v26 }
 0x577   :  { %v2688_v6 = vpop.f32.mrb[24].mxu1 }
 0x578   :  { %v1265_v31 = vadd.f32 %v2688_v6, %v2283_v33  ;;  %v1259_v9 = vpop.f32.mrb[25].mxu1 }
 0x579   :  { %v1260_v16 = vadd.f32 %v2283_v33, %v1259_v9 }
 0x57a   :  { %v3769_v57 = vadd.f32 %v1265_v31, %v3401_v39 }
 0x57b   :  { %v3766_v29 = vadd.f32 %v1260_v16, %v3403_v41 }
 0x57d   :  { %2718 = vmatprep.mubr.msk.f32.mxu0 %vm296_vm1, %v3766_v29 }
 0x57e   :  { %2719 = vmatmul.mubr.msk.f32.gmra.mrb[40].mxu0 %vm296_vm1, %v3769_v57 }
 0x5ab   :  { %v2691_v34 = vpop.f32.mrb[26].mxu1 }
 0x5ac   :  { %v1275_v36 = vadd.f32 %v2691_v34, %v2283_v33  ;;  %v1269_v40 = vpop.f32.mrb[27].mxu1 }
 0x5ad   :  { %v1270_v10 = vadd.f32 %v2283_v33, %v1269_v40 }
 0x5ae   :  { %v1309_v32 = vadd.f32 %v1275_v36, %v3411_v44 }
 0x5af   :  { %v1308_v63 = vadd.f32 %v1270_v10, %v3413_v46  ;;  %v2694_v22 = vpop.f32.mrb[28].mxu1 }
 0x5b0   :  { %v1285_v41 = vadd.f32 %v2694_v22, %v2283_v33  ;;  %v1279_v0 = vpop.f32.mrb[29].mxu1 }
 0x5b1   :  { %v1280_v7 = vadd.f32 %v2283_v33, %v1279_v0  ;;  %2721 = vmatprep.mubr.msk.f32.mxu0 %vm296_vm1, %v1308_v63 }
 0x5b2   :  { %2722 = vmatmul.mubr.msk.f32.gmra.mrb[42].mxu0 %vm296_vm1, %v1309_v32  ;;  %v1311_v47 = vadd.f32 %v1285_v41, %v3421_v49 }
 0x5b3   :  { %v1310_v39 = vadd.f32 %v1280_v7, %v3423_v51  ;;  %v2697_v37 = vpop.f32.mrb[30].mxu1  ;;  %v2300_v51 = vld [vmem:[%s3980_s6] ss:$0 sm:$0xff] }
 0x5b4   :  { %v1295_v11 = vadd.f32 %v2697_v37, %v2283_v33  ;;  %v1289_v50 = vpop.f32.mrb[31].mxu1 }
 0x5b5   :  { %v1290_v12 = vadd.f32 %v2283_v33, %v1289_v50  ;;  %2724 = vmatprep.mubr.msk.f32.mxu0 %vm296_vm1, %v1310_v39 }
 0x5b6   :  { %2725 = vmatmul.mubr.msk.f32.gmra.mrb[44].mxu0 %vm296_vm1, %v1311_v47  ;;  %v1313_v46 = vadd.f32 %v1295_v11, %v3435_v55 }
 0x5b7   :  { %v1312_v44 = vadd.f32 %v1290_v12, %v3437_v56 }
 0x5b9   :  { %2727 = vmatprep.mubr.msk.f32.mxu0 %vm296_vm1, %v1312_v44 }
 0x5ba   :  { %2728 = vmatmul.mubr.msk.f32.gmra.mrb[46].mxu0 %vm296_vm1, %v1313_v46 }
 0x61d   :  { %v2708_v49 = vpop.f32.mrb[32].mxu0 }
 0x61e   :  { %v3790_v15 = vadd.f32 %v2708_v49, %v2300_v51  ;;  %v1439_v54 = vpop.f32.mrb[33].mxu0 }
 0x61f   :  { %v3792_v53 = vadd.f32 %v2300_v51, %v1439_v54 }
 0x620   :  { %1522 = vrot.lane.b32.xlu0 %v3790_v15, %s3233_s13 }
 0x621   :  { %v2930_v55 = vpack.c.bf16 %v3790_v15, %v3792_v53  ;;  %v2711_v56 = vpop.f32.mrb[34].mxu0  ;;  %1520 = vrot.lane.b32.xlu1 %v3792_v53, %s3233_s13  ;;  %v3109_v58 = vpack.i.bf16 %v3790_v15, %v3792_v53 }
 0x622   :  { %v3802_v8 = vadd.f32 %v2711_v56, %v2300_v51  ;;  %v1449_v60 = vpop.f32.mrb[35].mxu0 }
 0x623   :  { %v3804_v43 = vadd.f32 %v2300_v51, %v1449_v60  ;;  %2932 = vmatprep.subr.msk.bf16.mxu1 %vm3478_vm2, %v2930_v55 }
 0x624   :  { %2935 = vmatpush3.bf16.xpose.msk.msra.mxu1 %vm3478_vm2, %v2930_v55 }
 0x625   :  { %v3114_v14 = vpack.i.bf16 %v3802_v8, %v3804_v43  ;;  %v2936_v4 = vpack.c.bf16 %v3802_v8, %v3804_v43  ;;  %v2714_v48 = vpop.f32.mrb[36].mxu0 }
 0x626   :  { %v3814_v33 = vadd.f32 %v2714_v48, %v2300_v51  ;;  %v1459_v52 = vpop.f32.mrb[37].mxu0 }
 0x627   :  { %v3816_v20 = vadd.f32 %v2300_v51, %v1459_v52  ;;  %2938 = vmatprep.subr.msk.bf16.mxu1 %vm3478_vm2, %v2936_v4 }
 0x629   :  { %v3124_v5 = vpack.i.bf16 %v3814_v33, %v3816_v20  ;;  %v2942_v38 = vpack.c.bf16 %v3814_v33, %v3816_v20  ;;  %v2717_v27 = vpop.f32.mrb[38].mxu0 }
 0x62a   :  { %v1475_v13 = vadd.f32 %v2717_v27, %v2300_v51  ;;  %v1469_v35 = vpop.f32.mrb[39].mxu0 }
 0x62b   :  { %v1470_v30 = vadd.f32 %v2300_v51, %v1469_v35 }
 0x62c   :  { %2941 = vmatpush3.bf16.xpose.msk.msra.mxu1 %vm3478_vm2, %v2936_v4 }
 0x62d   :  { %v3134_v62 = vpack.i.bf16 %v1475_v13, %v1470_v30  ;;  %v2948_v45 = vpack.c.bf16 %v1475_v13, %v1470_v30  ;;  %2944 = vmatprep.subr.msk.bf16.mxu1 %vm3478_vm2, %v2942_v38 }
 0x634   :  { %2947 = vmatpush3.bf16.xpose.msk.msra.mxu1 %vm3478_vm2, %v2942_v38 }
 0x635   :  { %2950 = vmatprep.subr.msk.bf16.mxu1 %vm3478_vm2, %v2948_v45 }
 0x63c   :  { %2953 = vmatpush3.bf16.xpose.msk.msra.mxu1 %vm3478_vm2, %v2948_v45 }
 0x651   :  { %v2720_v18 = vpop.f32.mrb[40].mxu0 }
 0x652   :  { %v1485_v21 = vadd.f32 %v2720_v18, %v2300_v51  ;;  %v1479_v1 = vpop.f32.mrb[41].mxu0 }
 0x653   :  { %v1480_v23 = vadd.f32 %v2300_v51, %v1479_v1 }
 0x655   :  { %v2954_v19 = vpack.c.bf16 %v1485_v21, %v1480_v23  ;;  %1627 = vrot.lane.b32.xlu1 %v1480_v23, %s3233_s13  ;;  %v3119_v28 = vpack.i.bf16 %v1485_v21, %v1480_v23 }
 0x657   :  { %2956 = vmatprep.subr.msk.bf16.mxu0 %vm3478_vm2, %v2954_v19 }
 0x658   :  { %2959 = vmatpush3.bf16.xpose.msk.msra.mxu0 %vm3478_vm2, %v2954_v19 }
 0x659   :  { %1629 = vrot.lane.b32.xlu1 %v1485_v21, %s3233_s13 }
 0x685   :  { %v2723_v2 = vpop.f32.mrb[42].mxu0 }
 0x686   :  { %v1495_v3 = vadd.f32 %v2723_v2, %v2300_v51  ;;  %v1489_v25 = vpop.f32.mrb[43].mxu0 }
 0x687   :  { %v1490_v59 = vadd.f32 %v2300_v51, %v1489_v25 }
 0x689   :  { %v3129_v24 = vpack.i.bf16 %v1495_v3, %v1490_v59  ;;  %v2960_v26 = vpack.c.bf16 %v1495_v3, %v1490_v59  ;;  %v2726_v6 = vpop.f32.mrb[44].mxu0 }
 0x68a   :  { %v3840_v31 = vadd.f32 %v2726_v6, %v2300_v51  ;;  %v1499_v9 = vpop.f32.mrb[45].mxu0 }
 0x68b   :  { %v3842_v16 = vadd.f32 %v2300_v51, %v1499_v9  ;;  %2962 = vmatprep.subr.msk.bf16.mxu0 %vm3478_vm2, %v2960_v26 }
 0x68c   :  { %2965 = vmatpush3.bf16.xpose.msk.msra.mxu0 %vm3478_vm2, %v2960_v26 }
 0x68d   :  { %v3139_v34 = vpack.i.bf16 %v3840_v31, %v3842_v16  ;;  %v2966_v36 = vpack.c.bf16 %v3840_v31, %v3842_v16  ;;  %v2729_v40 = vpop.f32.mrb[46].mxu0  ;;  %v1988_v31 = vld [vmem:[%s3981_s7 + $0x10] sm:$0xff]  ;;  %v1989_v16 = vld [vmem:[%s3981_s7 + $0x18] sm:$0xff] }
 0x68e   :  { %v3852_v10 = vadd.f32 %v2729_v40, %v2300_v51  ;;  %v1509_v63 = vpop.f32.mrb[47].mxu0 }
 0x68f   :  { %v3854_v22 = vadd.f32 %v2300_v51, %v1509_v63  ;;  %2968 = vmatprep.subr.msk.bf16.mxu0 %vm3478_vm2, %v2966_v36 }
 0x691   :  { %v3144_v32 = vpack.i.bf16 %v3852_v10, %v3854_v22  ;;  %v2972_v41 = vpack.c.bf16 %v3852_v10, %v3854_v22 }
 0x692   :  { %v1523_v7 = vpop.permute.xlu0 %1522 }
 0x693   :  { %v1521_v0 = vpop.permute.xlu1 %1520 }
 0x694   :  { %2971 = vmatpush3.bf16.xpose.msk.msra.mxu0 %vm3478_vm2, %v2966_v36  ;;  %2746 = vmatprep.mubr.msk.f32.mxu1 %vm296_vm1, %v1521_v0 }
 0x695   :  { %2974 = vmatprep.subr.msk.bf16.mxu0 %vm3478_vm2, %v2972_v41  ;;  %2747 = vmatmul.mubr.msk.f32.vlgmr.msra.gmra.mrb[32].mxu1 %vm296_vm1, %v1523_v7 }
 0x69c   :  { %2977 = vmatpush3.bf16.xpose.msk.msra.mxu0 %vm3478_vm2, %v2972_v41 }
 0x6c7   :  { %v1628_v39 = vpop.permute.xlu1 %1627 }
 0x6c8   :  { %2765 = vmatprep.mubr.msk.f32.mxu0 %vm296_vm1, %v1628_v39  ;;  %v1986_v39 = vld [vmem:[%s3981_s7] sm:$0xff] }
 0x6cb   :  { %v1630_v37 = vpop.permute.xlu1 %1629 }
 0x6cc   :  { %2766 = vmatmul.mubr.msk.f32.vlgmr.msra.gmra.mrb[48].mxu0 %vm296_vm1, %v1630_v37  ;;  %v1987_v37 = vld [vmem:[%s3981_s7 + $0x8] sm:$0xff] }
 0x768   :  { %v2748_v47 = vpop.f32.mrb[32].mxu1 }
 0x769   :  { %v1616_v11 = vpop.f32.mrb[33].mxu1  ;;  %v1735_v50 = vsel %vm611_vm3, %v2748_v47, -inf }
 0x76a   :  { %1736 = vmax.xlane.f32.xlu1 %v1735_v50  ;;  %v1732_v12 = vsel %vm611_vm3, %v1616_v11, -inf }
 0x76b   :  { %1733 = vmax.xlane.f32.xlu0 %v1732_v12  ;;  %v3014_v12 = vpack.c.bf16 %v1989_v16, %v1988_v31 }
 0x77b   :  { %3110 = vrot.lane.b32.xlu1 %v3109_v58, %s3234_s2 }
 0x77f   :  { %3120 = vrot.lane.b32.xlu1 %v3119_v28, %s3234_s2 }
 0x783   :  { %3125 = vrot.lane.b32.xlu1 %v3124_v5, %s3234_s2 }
 0x787   :  { %3135 = vrot.lane.b32.xlu1 %v3134_v62, %s3234_s2 }
 0x79f   :  { %v2767_v61 = vpop.f32.mrb[48].mxu0 }
 0x7a0   :  { %v1723_v44 = vpop.f32.mrb[49].mxu0  ;;  %v1741_v51 = vsel %vm611_vm3, %v2767_v61, -inf }
 0x7a1   :  { %v1738_v46 = vsel %vm611_vm3, %v1723_v44, -inf }
 0x7a2   :  { %1739 = vmax.xlane.f32.xlu0 %v1738_v46 }
 0x7a6   :  { %1742 = vmax.xlane.f32.xlu0 %v1741_v51 }
 0x7bc   :  { %3115 = vrot.lane.b32.xlu0 %v3114_v14, %s3234_s2 }
 0x7c0   :  { %3130 = vrot.lane.b32.xlu0 %v3129_v24, %s3234_s2 }
 0x7f7   :  { %v1737_v49 = vpop.xlane.xlu1 %1736 }
 0x7f8   :  { %v1745_v15 = vsub.f32 %v2748_v47, %v1737_v49  ;;  %v1734_v54 = vpop.xlane.xlu0 %1733  ;;  %v3010_v47 = vpack.c.bf16 %v1987_v37, %v1986_v39  ;;  %v3232_v39 = vld [vmem:[%s3975_s0 + $0x40] sm:$0xff] }
 0x7f9   :  { %v1744_v53 = vsub.f32 %v1616_v11, %v1734_v54 }
 0x7fa   :  { %v1750_v55 = vmul.f32 1.442695, %v1745_v15 }
 0x7fb   :  { %v1748_v56 = vmul.f32 1.442695, %v1744_v53  ;;  %v3111_v58 = vpop.permute.xlu1 %3110 }
 0x7fc   :  { %3213 = vpow2.f32 %v1750_v55  ;;  %v3113_v60 = vunpack.i.h.bf16 %v3111_v58  ;;  %v3112_v4 = vunpack.i.l.bf16 %v3111_v58 }
 0x7fd   :  { %3215 = vpow2.f32 %v1748_v56 }
 0x7fe   :  { %v2978_v48 = vpack.c.bf16 %v3113_v60, %v3112_v4 }
 0x7ff   :  { %v3121_v33 = vpop.permute.xlu1 %3120 }
 0x800   :  { %v3123_v52 = vunpack.i.h.bf16 %v3121_v33  ;;  %v3122_v20 = vunpack.i.l.bf16 %v3121_v33  ;;  %2979 = vmatprep.subr.bf16.mxu1 %v2978_v48  ;;  %v2098_v33 = vld [vmem:[%s3982_s9] sm:$0xff] }
 0x801   :  { %2981 = vmatpush3.bf16.msra.mxu1 %v2978_v48 }
 0x802   :  { %v2994_v8 = vpack.c.bf16 %v3123_v52, %v3122_v20  ;;  %v2099_v52 = vld [vmem:[%s3982_s9 + $0x8] sm:$0xff] }
 0x803   :  { %v3126_v30 = vpop.permute.xlu1 %3125  ;;  %v3018_v20 = vpack.c.bf16 %v2099_v52, %v2098_v33 }
 0x804   :  { %2995 = vmatprep.subr.bf16.mxu0 %v2994_v8  ;;  %v3128_v21 = vunpack.i.h.bf16 %v3126_v30  ;;  %v3127_v1 = vunpack.i.l.bf16 %v3126_v30 }
 0x805   :  { %2997 = vmatpush3.bf16.msra.mxu0 %v2994_v8 }
 0x806   :  { %v3214_v43 = vpop.eup %3213  ;;  %v2986_v25 = vpack.c.bf16 %v3128_v21, %v3127_v1 }
 0x807   :  { %v3216_v14 = vpop.eup %3215  ;;  %v1759_v5 = vsel %vm611_vm3, %v3214_v43, 0.0  ;;  %v3136_v2 = vpop.permute.xlu1 %3135 }
 0x808   :  { %1760 = vadd.xlane.f32.xlu0 %v1759_v5  ;;  %v1756_v38 = vsel %vm611_vm3, %v3216_v14, 0.0  ;;  %v3138_v24 = vunpack.i.h.bf16 %v3136_v2  ;;  %v3137_v26 = vunpack.i.l.bf16 %v3136_v2 }
 0x809   :  { %1757 = vadd.xlane.f32.xlu1 %v1756_v38  ;;  %v2100_v38 = vld [vmem:[%s3982_s9 + $0x10] sm:$0xff] }
 0x80a   :  { %v2990_v41 = vpack.c.bf16 %v3138_v24, %v3137_v26 }
 0x82f   :  { %v1740_v27 = vpop.xlane.xlu0 %1739 }
 0x830   :  { %v1746_v13 = vsub.f32 %v1723_v44, %v1740_v27  ;;  %v2101_v27 = vld [vmem:[%s3982_s9 + $0x18] sm:$0xff] }
 0x832   :  { %v1752_v35 = vmul.f32 1.442695, %v1746_v13  ;;  %v3022_v13 = vpack.c.bf16 %v2101_v27, %v2100_v38 }
 0x833   :  { %v1743_v62 = vpop.xlane.xlu0 %1742 }
 0x834   :  { %3217 = vpow2.f32 %v1752_v35  ;;  %v1747_v45 = vsub.f32 %v2767_v61, %v1743_v62  ;;  %v2341_v35 = vld [vmem:[%s3983_s8] ss:$0 sm:$0xff] }
 0x836   :  { %v1754_v18 = vmul.f32 1.442695, %v1747_v45 }
 0x837   :  { %v3116_v23 = vpop.permute.xlu0 %3115 }
 0x838   :  { %3219 = vpow2.f32 %v1754_v18  ;;  %v3118_v19 = vunpack.i.h.bf16 %v3116_v23  ;;  %v3117_v28 = vunpack.i.l.bf16 %v3116_v23 }
 0x83a   :  { %v2982_v3 = vpack.c.bf16 %v3118_v19, %v3117_v28 }
 0x83b   :  { %v3131_v59 = vpop.permute.xlu0 %3130 }
 0x83c   :  { %v3133_v6 = vunpack.i.h.bf16 %v3131_v59  ;;  %v3132_v9 = vunpack.i.l.bf16 %v3131_v59  ;;  %2983 = vmatprep.subr.bf16.mxu1 %v2982_v3 }
 0x83d   :  { %2985 = vmatpush3.bf16.msra.mxu1 %v2982_v3 }
 0x83e   :  { %v3218_v36 = vpop.eup %3217  ;;  %v2998_v40 = vpack.c.bf16 %v3133_v6, %v3132_v9  ;;  %2987 = vmatprep.subr.bf16.mxu1 %v2986_v25  ;;  %v3229_v6 = vld [vmem:[%s3975_s0 + $0x8] sm:$0xff] }
 0x83f   :  { %v1762_v63 = vsel %vm611_vm3, %v3218_v36, 0.0 }
 0x840   :  { %1763 = vadd.xlane.f32.xlu1 %v1762_v63  ;;  %2999 = vmatprep.subr.bf16.mxu0 %v2998_v40 }
 0x841   :  { %2989 = vmatpush3.bf16.msra.mxu1 %v2986_v25  ;;  %3001 = vmatpush3.bf16.msra.mxu0 %v2998_v40 }
 0x842   :  { %v3220_v0 = vpop.eup %3219  ;;  %2991 = vmatprep.subr.bf16.mxu1 %v2990_v41 }
 0x843   :  { %v1765_v7 = vsel %vm611_vm3, %v3220_v0, 0.0 }
 0x844   :  { %1766 = vadd.xlane.f32.xlu0 %v1765_v7 }
 0x845   :  { %2993 = vmatpush3.bf16.msra.mxu1 %v2990_v41 }
 0x846   :  { %3011 = vmatprep.subr.bf16.mxu1 %v3010_v47 }
 0x851   :  { %3145 = vrot.lane.b32.xlu1 %v3144_v32, %s3234_s2 }
 0x85a   :  { %3140 = vrot.lane.b32.xlu0 %v3139_v34, %s3234_s2 }
 0x895   :  { %v1761_v11 = vpop.xlane.xlu0 %1760 }
 0x896   :  { %3221 = vrcp.f32 %v1761_v11  ;;  %v1758_v50 = vpop.xlane.xlu1 %1757 }
 0x897   :  { %3223 = vrcp.f32 %v1758_v50 }
 0x8a0   :  { %v3222_v10 = vpop.eup %3221 }
 0x8a1   :  { %v3224_v34 = vpop.eup %3223  ;;  %v1773_v32 = vmul.f32 %v3222_v10, %v3214_v43 }
 0x8a2   :  { %v1772_v22 = vmul.f32 %v3224_v34, %v3216_v14 }
 0x8a4   :  { %2784 = vmatprep.mubr.msk.f32.mxu1 %vm611_vm3, %v1772_v22 }
 0x8a5   :  { %2785 = vmatmul.mubr.msk.f32.vlgmr.msra.gmra.mrb[34].mxu1 %vm611_vm3, %v1773_v32 }
 0x8a6   :  { %3013 = vmatpush3.bf16.msra.mxu1 %v3010_v47 }
 0x8a7   :  { %3015 = vmatprep.subr.bf16.mxu1 %v3014_v12 }
 0x8aa   :  { %3017 = vmatpush3.bf16.msra.mxu1 %v3014_v12 }
 0x8cd   :  { %v1764_v61 = vpop.xlane.xlu1 %1763 }
 0x8ce   :  { %3225 = vrcp.f32 %v1764_v61 }
 0x8d1   :  { %v1767_v44 = vpop.xlane.xlu0 %1766  ;;  %v3146_v46 = vpop.permute.xlu1 %3145 }
 0x8d2   :  { %3227 = vrcp.f32 %v1767_v44  ;;  %v3148_v49 = vunpack.i.h.bf16 %v3146_v46  ;;  %v3147_v15 = vunpack.i.l.bf16 %v3146_v46 }
 0x8d4   :  { %v3006_v60 = vpack.c.bf16 %v3148_v49, %v3147_v15 }
 0x8d5   :  { %v3141_v51 = vpop.permute.xlu0 %3140 }
 0x8d6   :  { %v3143_v54 = vunpack.i.h.bf16 %v3141_v51  ;;  %v3142_v53 = vunpack.i.l.bf16 %v3141_v51 }
 0x8d8   :  { %v3226_v55 = vpop.eup %3225  ;;  %v3002_v56 = vpack.c.bf16 %v3143_v54, %v3142_v53 }
 0x8d9   :  { %v1774_v58 = vmul.f32 %v3226_v55, %v3218_v36 }
 0x8da   :  { %3003 = vmatprep.subr.bf16.mxu0 %v3002_v56 }
 0x8db   :  { %3005 = vmatpush3.bf16.msra.mxu0 %v3002_v56  ;;  %2803 = vmatprep.mubr.msk.f32.mxu0 %vm611_vm3, %v1774_v58 }
 0x8dc   :  { %3007 = vmatprep.subr.bf16.mxu0 %v3006_v60  ;;  %v3228_v4 = vpop.eup %3227 }
 0x8dd   :  { %v1775_v48 = vmul.f32 %v3228_v4, %v3220_v0  ;;  %v3231_v0 = vld [vmem:[%s3975_s0 + $0x48] sm:$0xff] }
 0x8df   :  { %3009 = vmatpush3.bf16.msra.mxu0 %v3006_v60 }
 0x8e0   :  { %3019 = vmatprep.subr.bf16.mxu0 %v3018_v20 }
 0x8e2   :  { %2804 = vmatmul.mubr.msk.f32.vlgmr.msra.gmra.mrb[50].mxu0 %vm611_vm3, %v1775_v48 }
 0x8e3   :  { %3021 = vmatpush3.bf16.msra.mxu0 %v3018_v20 }
 0x8e4   :  { %3023 = vmatprep.subr.bf16.mxu0 %v3022_v13 }
 0x8e7   :  { %3025 = vmatpush3.bf16.msra.mxu0 %v3022_v13 }
 0x978   :  { %v2786_v8 = vpop.f32.mrb[34].mxu1 }
 0x979   :  { %v1872_v43 = vpop.f32.mrb[35].mxu1 }
 0x97a   :  { %2814 = vmatprep.mubr.msk.f32.mxu1 %vm296_vm1, %v1872_v43 }
 0x97b   :  { %2815 = vmatmul.mubr.msk.f32.vlgmr.msra.gmra.mrb[36].mxu1 %vm296_vm1, %v2786_v8 }
 0x9b5   :  { %v2805_v14 = vpop.f32.mrb[50].mxu0 }
 0x9b6   :  { %v1977_v5 = vpop.f32.mrb[51].mxu0 }
 0x9b7   :  { %2817 = vmatprep.mubr.msk.f32.mxu1 %vm296_vm1, %v1977_v5 }
 0x9b8   :  { %2818 = vmatmul.mubr.msk.f32.gmra.mrb[38].mxu1 %vm296_vm1, %v2805_v14 }
 0xa4e   :  { %v2816_v30 = vpop.f32.mrb[36].mxu1 }
 0xa4f   :  { %v2081_v62 = vadd.f32 %v2816_v30, %v2341_v35  ;;  %v2075_v45 = vpop.f32.mrb[37].mxu1 }
 0xa50   :  { %v2076_v18 = vadd.f32 %v2341_v35, %v2075_v45 }
 0xa51   :  { %v2095_v1 = vadd.f32 %v2081_v62, %v3747_v42 }
 0xa52   :  { %v2094_v21 = vadd.f32 %v2076_v18, %v3744_v17  ;;  %v2346_v17 = vld [vmem:[%s3984_s10] ss:$0 sm:$0xff] }
 0xa54   :  { %2828 = vmatprep.mubr.msk.f32.mxu0 %vm296_vm1, %v2094_v21 }
 0xa55   :  { %2829 = vmatmul.mubr.msk.f32.vlgmr.msra.gmra.mrb[52].mxu0 %vm296_vm1, %v2095_v1 }
 0xa8b   :  { %v2819_v23 = vpop.f32.mrb[38].mxu1 }
 0xa8c   :  { %v2091_v19 = vadd.f32 %v2819_v23, %v2341_v35  ;;  %v2085_v28 = vpop.f32.mrb[39].mxu1 }
 0xa8d   :  { %v2086_v2 = vadd.f32 %v2341_v35, %v2085_v28 }
 0xa8e   :  { %v2097_v25 = vadd.f32 %v2091_v19, %v3769_v57 }
 0xa8f   :  { %v2096_v3 = vadd.f32 %v2086_v2, %v3766_v29  ;;  %v3230_v29 = vld [vmem:[%s3975_s0] sm:$0xff] }
 0xa91   :  { %2831 = vmatprep.mubr.msk.f32.mxu0 %vm296_vm1, %v2096_v3 }
 0xa92   :  { %2832 = vmatmul.mubr.msk.f32.gmra.mrb[54].mxu0 %vm296_vm1, %v2097_v25 }
 0xb28   :  { %v2830_v42 = vpop.f32.mrb[52].mxu0 }
 0xb29   :  { %v2193_v59 = vadd.f32 %v2830_v42, %v2346_v17  ;;  %v2187_v24 = vpop.f32.mrb[53].mxu0 }
 0xb2a   :  { %v2188_v26 = vadd.f32 %v2346_v17, %v2187_v24 }
 0xb2b   :  { %v2207_v9 = vadd.f32 %v3229_v6, %v2193_v59 }
 0xb2c   :  { %v2206_v57 = vadd.f32 %v3230_v29, %v2188_v26 }
 0xb2d   :  { %2211 = vst.msk [vmem:[%s3985_s11 + $0x8] sm:$0xff] %vm62_vm0, %v2207_v9 }
 0xb2e   :  { %2210 = vst.msk [vmem:[%s3985_s11] sm:$0xff] %vm62_vm0, %v2206_v57 }
 0xb65   :  { %v2833_v36 = vpop.f32.mrb[54].mxu0 }
 0xb66   :  { %v2203_v40 = vadd.f32 %v2833_v36, %v2346_v17  ;;  %v2197_v63 = vpop.f32.mrb[55].mxu0 }
 0xb67   :  { %v2198_v41 = vadd.f32 %v2346_v17, %v2197_v63 }
 0xb68   :  { %v2209_v7 = vadd.f32 %v3231_v0, %v2203_v40 }
 0xb69   :  { %v2208_v37 = vadd.f32 %v3232_v39, %v2198_v41 }
 0xb6a   :  { %2213 = vst.msk [vmem:[%s3985_s11 + $0x18] sm:$0xff] %vm62_vm0, %v2209_v7 }
 0xb6b   :  { %2212 = vst.msk [vmem:[%s3985_s11 + $0x10] sm:$0xff] %vm62_vm0, %v2208_v37 }

</bundles_post_ra>
